<compile_context>
chip_gen: v7x
topology: tpu7x:2x2x1
jax: 0.10.0
libtpu: 0.0.40
codegen_flags: <defaults>
</compile_context>

<pallas_src>
import functools
import math

import numpy as np
import jax
import jax.numpy as jnp
from jax.experimental import pallas as pl
from jax.experimental.pallas import tpu as pltpu


NUM_CLASS = 100
OUT_PAD = 128                       # lane-dense padded classifier width (first 100 real)
BN_EPS = 1e-5
IMG_H, IMG_W, IMG_C = 16, 16, 3
# (cin, cout, H, W) for the three conv blocks
CONV_CFG = [(3, 8, 16, 16), (8, 16, 8, 8), (16, 32, 4, 4)]
# padded K per layer = round_up((W+1)*cin, 8) = width of the padded activation slab
KPAD = [56, 72, 80]


def _round8(n):
    return ((n + 7) // 8) * 8


# ---------------------------------------------------------------------------
# Fused Pallas kernel: whole VGG forward for one batch chunk, all VMEM-resident.
# ---------------------------------------------------------------------------

def _vgg_kernel(x_ref, p_ref, out_ref, pad1, pad2, pad3, mbuf, *, cb, off):
    f32 = jnp.float32

    def par(name, rows, cols=128):
        o = off[name]                                   # static, 8-row aligned
        return p_ref[o:o + rows, 0:cols]

    # Zero the padded activation scratches once per step (borders / unused cols stay 0).
    pad1[...] = jnp.zeros(pad1.shape, f32)
    pad2[...] = jnp.zeros(pad2.shape, f32)
    pad3[...] = jnp.zeros(pad3.shape, f32)

    # Stage the chunk's images into the layer-1 padded slab (lane offset 0, per-image
    # zero rows above/below each image).
    for n in range(cb):
        pad1[n * 18 + 1:n * 18 + 17, 0:IMG_W * IMG_C] = x_ref[n * 16:(n + 1) * 16, :]

    def conv_block(pad, lname, H, kdim):
        """Batched conv(3x3,pad1)+BN-shift+ReLU fused with 2x2 max-pool.
        pad: (cb*(H+2), kdim) padded slab, row = image-row, col = x*cin + c.
        Returns pooled activations (cb*(H//2+1)-1, 64): per image, H//2 useful rows
        followed by one junk row (no junk row after the last image)."""
        M = cb * (H + 2) - 2
        # dy folded as 3 sublane-shifted slabs; dx folded into the banded B matrices.
        acc = jnp.dot(pad[0:M, :], par(f"{lname}_b0", kdim), preferred_element_type=f32)
        acc += jnp.dot(pad[1:1 + M, :], par(f"{lname}_b1", kdim), preferred_element_type=f32)
        acc += jnp.dot(pad[2:2 + M, :], par(f"{lname}_b2", kdim), preferred_element_type=f32)
        r = jnp.maximum(acc + par(f"{lname}_bias", 1), 0.0)            # (M, 128)
        # x-direction pool: even/odd column-group selection matmuls + elementwise max.
        m = jnp.maximum(
            jnp.dot(r, par(f"{lname}_sxe", 128, 64), preferred_element_type=f32),
            jnp.dot(r, par(f"{lname}_sxo", 128, 64), preferred_element_type=f32))  # (M, 64)
        # y-direction pool on VPU: stash to scratch, strided-read even/odd rows, max.
        mbuf[0:M, :] = m
        Mh = M // 2
        ev = mbuf[pl.ds(0, Mh, stride=2), :]
        od = mbuf[pl.ds(1, Mh, stride=2), :]
        return jnp.maximum(ev, od)                                     # (Mh, 64)

    # Layer 1: 16x16x3 -> 8x8x8
    p1 = conv_block(pad1, "c0", 16, KPAD[0])            # (cb*9-1, 64)
    for n in range(cb):
        pad2[n * 10 + 1:n * 10 + 9, 0:64] = p1[n * 9:n * 9 + 8, :]
    # Layer 2: 8x8x8 -> 4x4x16
    p2 = conv_block(pad2, "c1", 8, KPAD[1])             # (cb*5-1, 64)
    for n in range(cb):
        pad3[n * 6 + 1:n * 6 + 5, 0:64] = p2[n * 5:n * 5 + 4, :]
    # Layer 3: 4x4x16 -> 2x2x32
    p3 = conv_block(pad3, "c2", 4, KPAD[2])             # (cb*3-1, 64)

    # FC head, batched over the chunk. Gather the two spatial rows (h=0 / h=1) of every
    # image with strided reads; the NCHW-flatten permutation is folded into w1a/w1b.
    mbuf[0:cb * 3 - 1, :] = p3
    f0 = mbuf[pl.ds(0, cb, stride=3), :]                # (cb, 64)  h = 0 rows
    f1 = mbuf[pl.ds(1, cb, stride=3), :]                # (cb, 64)  h = 1 rows
    h1 = jnp.maximum(
        jnp.dot(f0, par("w1a", 64), preferred_element_type=f32)
        + jnp.dot(f1, par("w1b", 64), preferred_element_type=f32)
        + par("fb1", 1), 0.0)                                            # (cb, 128)
    h2 = jnp.maximum(jnp.dot(h1, par("w2", 128), preferred_element_type=f32)
                     + par("fb2", 1), 0.0)                               # (cb, 128) cols>=64 are 0
    logits = jnp.dot(h2, par("wc", 128), preferred_element_type=f32) + par("bc", 1)  # (cb, 128)

    rows_out = out_ref.shape[0]
    out_ref[0:cb, :] = logits
    if cb < rows_out:
        out_ref[cb:rows_out, :] = jnp.zeros((rows_out - cb, 128), f32)


# ---------------------------------------------------------------------------
# Parameter construction + packing into one 128-lane slab.
# ---------------------------------------------------------------------------

class _Packer:
    def __init__(self):
        self.segs = []
        self.off = {}
        self.total = 0

    def add(self, name, arr):
        arr = np.asarray(arr, np.float32)
        r, c = arr.shape
        rp = _round8(r)
        buf = np.zeros((rp, 128), np.float32)
        buf[:r, :c] = arr
        self.off[name] = self.total
        self.segs.append(buf)
        self.total += rp

    def pack(self):
        return jnp.asarray(np.concatenate(self.segs, axis=0))


def _conv_band_mats(wf, W, cin, cout, kpad):
    """wf: (3,3,cin,cout) BN-scaled conv weight -> 3 banded matrices B_ky of shape
    (kpad, W*cout): B_ky[x_in*cin+ci, x*cout+co] = wf[ky, x_in-x+1, ci, co]."""
    mats = np.zeros((3, kpad, W * cout), np.float32)
    for ky in range(3):
        for x in range(W):
            for kx in range(3):
                xi = x + kx - 1
                if xi < 0:
                    continue                            # left pad -> zero contribution
                r0 = xi * cin
                if r0 + cin > kpad:
                    continue
                mats[ky, r0:r0 + cin, x * cout:(x + 1) * cout] = wf[ky, kx]
    return mats


def _pool_x_selectors(W, cout):
    half = W // 2
    ee = np.zeros((W, half), np.float32)
    eo = np.zeros((W, half), np.float32)
    ee[2 * np.arange(half), np.arange(half)] = 1.0
    eo[2 * np.arange(half) + 1, np.arange(half)] = 1.0
    sxe = np.kron(ee, np.eye(cout, dtype=np.float32))   # (W*cout, (W/2)*cout)
    sxo = np.kron(eo, np.eye(cout, dtype=np.float32))
    return sxe, sxo


def init_params(key):
    raw = {"conv": []}
    pk = _Packer()
    for l, (cin, cout, H, W) in enumerate(CONV_CFG):
        key, kw = jax.random.split(key)
        n = 3 * 3 * cout
        w = jax.random.normal(kw, (3, 3, cin, cout), jnp.float32) * math.sqrt(2.0 / n)
        conv_bias = jnp.zeros((cout,), jnp.float32)
        gamma = jnp.ones((cout,), jnp.float32)
        beta = jnp.zeros((cout,), jnp.float32)
        run_mean = jnp.zeros((cout,), jnp.float32)
        run_var = jnp.ones((cout,), jnp.float32)
        scale = gamma / jnp.sqrt(run_var + BN_EPS)
        shift = beta + (conv_bias - run_mean) * scale
        raw["conv"].append((w, scale, shift))

        wf = np.asarray(w) * np.asarray(scale)           # fold BN scale into conv weight
        mats = _conv_band_mats(wf, W, cin, cout, KPAD[l])
        for ky in range(3):
            pk.add(f"c{l}_b{ky}", mats[ky])
        pk.add(f"c{l}_bias", np.tile(np.asarray(shift).reshape(1, cout), (1, W)))  # (1,128)
        sxe, sxo = _pool_x_selectors(W, cout)
        pk.add(f"c{l}_sxe", sxe)
        pk.add(f"c{l}_sxo", sxo)

    # FC head: Linear(128->128), Linear(128->64), classifier Linear(64->100).
    key, kw = jax.random.split(key)
    w1 = jax.random.normal(kw, (128, 128), jnp.float32) * 0.01
    b1 = jnp.zeros((128,), jnp.float32)
    key, kw = jax.random.split(key)
    w2 = jax.random.normal(kw, (128, 64), jnp.float32) * 0.01
    b2 = jnp.zeros((64,), jnp.float32)
    key, kw = jax.random.split(key)
    wc = jax.random.normal(kw, (64, NUM_CLASS), jnp.float32) * 0.01
    bc = jnp.zeros((NUM_CLASS,), jnp.float32)
    raw.update(w1=w1, b1=b1, w2=w2, b2=b2, wc=wc, bc=bc)

    # Fold the PyTorch NCHW-flatten permutation into FC1 (kernel features are (h,w,c)),
    # split by the two spatial rows h=0/h=1 to avoid any in-kernel concat.
    C3, H3, W3 = 32, 2, 2
    perm = [c * (H3 * W3) + h * W3 + ww
            for h in range(H3) for ww in range(W3) for c in range(C3)]
    w1_hwc = np.asarray(w1)[np.asarray(perm), :]
    pk.add("w1a", w1_hwc[:64])
    pk.add("w1b", w1_hwc[64:])
    pk.add("fb1", np.asarray(b1).reshape(1, 128))
    w2p = np.zeros((128, 128), np.float32)
    w2p[:, :64] = np.asarray(w2)
    pk.add("w2", w2p)
    pk.add("fb2", np.asarray(b2).reshape(1, 64))
    wcp = np.zeros((128, 128), np.float32)
    wcp[:64, :NUM_CLASS] = np.asarray(wc)
    pk.add("wc", wcp)
    pk.add("bc", np.asarray(bc).reshape(1, NUM_CLASS))
    return {"raw": raw, "pslab": pk.pack(), "offsets": pk.off}


# ---------------------------------------------------------------------------
# Forward pass (single pallas_call, grid over batch chunks) and pure-JAX reference.
# ---------------------------------------------------------------------------

def make_vgg_forward(offsets):
    @jax.jit
    def fwd(x_nchw, pslab):
        N = x_nchw.shape[0]
        chunks = 2 if N >= 2 else 1                      # use both v7x TensorCores
        cb = (N + chunks - 1) // chunks                  # images per chunk (batched along M)
        n_pad = chunks * cb
        rows_out = _round8(cb)

        x = jnp.transpose(x_nchw, (0, 2, 3, 1)).astype(jnp.float32)    # NHWC
        if n_pad > N:
            x = jnp.concatenate(
                [x, jnp.zeros((n_pad - N,) + x.shape[1:], jnp.float32)], axis=0)
        x2d = x.reshape(n_pad * IMG_H, IMG_W * IMG_C)                   # (n_pad*16, 48)

        PR = pslab.shape[0]
        kern = functools.partial(_vgg_kernel, cb=cb, off=offsets)
        out = pl.pallas_call(
            kern,
            out_shape=jax.ShapeDtypeStruct((chunks * rows_out, OUT_PAD), jnp.float32),
            grid=(chunks,),
            in_specs=[
                pl.BlockSpec((cb * IMG_H, IMG_W * IMG_C), lambda i: (i, 0)),
                pl.BlockSpec((PR, 128), lambda i: (0, 0)),   # one packed parameter slab
            ],
            out_specs=pl.BlockSpec((rows_out, OUT_PAD), lambda i: (i, 0)),
            scratch_shapes=[
                pltpu.VMEM((cb * 18, KPAD[0]), jnp.float32),   # padded acts, layer 1
                pltpu.VMEM((cb * 10, KPAD[1]), jnp.float32),   # padded acts, layer 2
                pltpu.VMEM((cb * 6, KPAD[2]), jnp.float32),    # padded acts, layer 3
                pltpu.VMEM((cb * 18, 64), jnp.float32),        # pool / FC staging buffer
            ],
            compiler_params=pltpu.CompilerParams(dimension_semantics=("parallel",)),
        )(x2d, pslab)
        out = out.reshape(chunks, rows_out, OUT_PAD)[:, :cb, :NUM_CLASS]
        return out.reshape(n_pad, NUM_CLASS)[:N]

    return fwd


def vgg_reference(x_nchw, raw):
    """Plain-JAX reference (eval-mode BN / Dropout) for numerical validation."""
    x = jnp.transpose(x_nchw, (0, 2, 3, 1)).astype(jnp.float32)
    for (w, scale, shift) in raw["conv"]:
        y = jax.lax.conv_general_dilated(
            x, w, window_strides=(1, 1), padding=((1, 1), (1, 1)),
            dimension_numbers=("NHWC", "HWIO", "NHWC"),
            precision=jax.lax.Precision.HIGHEST)
        y = jnp.maximum(y * scale + shift, 0.0)
        x = jax.lax.reduce_window(y, -jnp.inf, jax.lax.max,
                                  (1, 2, 2, 1), (1, 2, 2, 1), "VALID")
    N = x.shape[0]
    f = jnp.transpose(x, (0, 3, 1, 2)).reshape(N, -1)    # PyTorch NCHW flatten order
    h = jnp.maximum(jnp.dot(f, raw["w1"], precision=jax.lax.Precision.HIGHEST) + raw["b1"], 0.0)
    h = jnp.maximum(jnp.dot(h, raw["w2"], precision=jax.lax.Precision.HIGHEST) + raw["b2"], 0.0)
    return jnp.dot(h, raw["wc"], precision=jax.lax.Precision.HIGHEST) + raw["bc"]


if __name__ == "__main__":
    key = jax.random.PRNGKey(0)
    key, kx = jax.random.split(key)
    x = jax.random.normal(kx, (2, IMG_C, IMG_H, IMG_W), jnp.float32)   # NCHW, like PyTorch
    params = init_params(key)

    fwd = make_vgg_forward(params["offsets"])
    out = jax.block_until_ready(fwd(x, params["pslab"]))
    assert out.shape == (2, NUM_CLASS), out.shape
    assert out.dtype == jnp.float32

    ref = vgg_reference(x, params["raw"])
    err = float(jnp.max(jnp.abs(out - ref)))
    assert err < 1e-3, f"kernel/reference mismatch: max abs err {err}"
    print("KERNEL_OK")
</pallas_src>

<mosaic_0001>
module attributes {stable_mosaic.version = 11 : i64} {
  func.func @_vgg_kernel(%arg0: i32, %arg1: memref<16x48xf32, #tpu.memory_space<vmem>>, %arg2: memref<1824x128xf32, #tpu.memory_space<vmem>>, %arg3: memref<8x128xf32, #tpu.memory_space<vmem>>, %arg4: memref<18x56xf32, #tpu.memory_space<vmem>>, %arg5: memref<10x72xf32, #tpu.memory_space<vmem>>, %arg6: memref<6x80xf32, #tpu.memory_space<vmem>>, %arg7: memref<18x64xf32, #tpu.memory_space<vmem>>) attributes {dimension_semantics = [#tpu.dimension_semantics<parallel>], iteration_bounds = array<i64: 2>, scalar_prefetch = 0 : i64, scratch_operands = 4 : i64, tpu.core_type = #tpu.core_type<tc>, window_params = [{transform_indices = @transform_0, window_bounds = array<i64: 16, 48>}, {pipeline_mode = #tpu.pipeline_mode<synchronous>, transform_indices = @transform_1, window_bounds = array<i64: 1824, 128>}, {transform_indices = @transform_2, window_bounds = array<i64: 8, 128>}]} {
    %cst = arith.constant 0.000000e+00 : f32
    %0 = vector.broadcast %cst : f32 to vector<18x56xf32>
    %c0 = arith.constant 0 : index
    %c0_0 = arith.constant 0 : index
    %1 = vector.load %arg4[%c0, %c0_0] : memref<18x56xf32, #tpu.memory_space<vmem>>, vector<18x56xf32>
    tpu.vector_store %arg4[%c0, %c0_0], %0 {strides = array<i32>} : memref<18x56xf32, #tpu.memory_space<vmem>>, vector<18x56xf32>,
    %cst_1 = arith.constant 0.000000e+00 : f32
    %2 = vector.broadcast %cst_1 : f32 to vector<10x72xf32>
    %c0_2 = arith.constant 0 : index
    %c0_3 = arith.constant 0 : index
    %3 = vector.load %arg5[%c0_2, %c0_3] : memref<10x72xf32, #tpu.memory_space<vmem>>, vector<10x72xf32>
    tpu.vector_store %arg5[%c0_2, %c0_3], %2 {strides = array<i32>} : memref<10x72xf32, #tpu.memory_space<vmem>>, vector<10x72xf32>,
    %cst_4 = arith.constant 0.000000e+00 : f32
    %4 = vector.broadcast %cst_4 : f32 to vector<6x80xf32>
    %c0_5 = arith.constant 0 : index
    %c0_6 = arith.constant 0 : index
    %5 = vector.load %arg6[%c0_5, %c0_6] : memref<6x80xf32, #tpu.memory_space<vmem>>, vector<6x80xf32>
    tpu.vector_store %arg6[%c0_5, %c0_6], %4 {strides = array<i32>} : memref<6x80xf32, #tpu.memory_space<vmem>>, vector<6x80xf32>,
    %c0_7 = arith.constant 0 : index
    %c0_8 = arith.constant 0 : index
    %6 = vector.load %arg1[%c0_7, %c0_8] : memref<16x48xf32, #tpu.memory_space<vmem>>, vector<16x48xf32>
    %c1 = arith.constant 1 : index
    %c0_9 = arith.constant 0 : index
    %7 = vector.load %arg4[%c1, %c0_9] : memref<18x56xf32, #tpu.memory_space<vmem>>, vector<16x48xf32>
    tpu.vector_store %arg4[%c1, %c0_9], %6 {strides = array<i32>} : memref<18x56xf32, #tpu.memory_space<vmem>>, vector<16x48xf32>,
    %c0_10 = arith.constant 0 : index
    %c0_11 = arith.constant 0 : index
    %8 = vector.load %arg4[%c0_10, %c0_11] : memref<18x56xf32, #tpu.memory_space<vmem>>, vector<16x56xf32>
    %c0_12 = arith.constant 0 : index
    %c0_13 = arith.constant 0 : index
    %9 = vector.load %arg2[%c0_12, %c0_13] : memref<1824x128xf32, #tpu.memory_space<vmem>>, vector<56x128xf32>
    %cst_14 = arith.constant dense<0.000000e+00> : vector<16x128xf32>
    %10 = tpu.matmul %8, %9, %cst_14 {dimension_numbers = #tpu.dot_dimension_numbers<[1], [0], [0], [1], [0, 0, 1, 1], [], []>} : vector<16x56xf32>, vector<56x128xf32>, vector<16x128xf32> -> vector<16x128xf32>
    %c1_15 = arith.constant 1 : index
    %c0_16 = arith.constant 0 : index
    %11 = vector.load %arg4[%c1_15, %c0_16] : memref<18x56xf32, #tpu.memory_space<vmem>>, vector<16x56xf32>
    %c56 = arith.constant 56 : index
    %c0_17 = arith.constant 0 : index
    %12 = vector.load %arg2[%c56, %c0_17] : memref<1824x128xf32, #tpu.memory_space<vmem>>, vector<56x128xf32>
    %cst_18 = arith.constant dense<0.000000e+00> : vector<16x128xf32>
    %13 = tpu.matmul %11, %12, %cst_18 {dimension_numbers = #tpu.dot_dimension_numbers<[1], [0], [0], [1], [0, 0, 1, 1], [], []>} : vector<16x56xf32>, vector<56x128xf32>, vector<16x128xf32> -> vector<16x128xf32>
    %14 = arith.addf %10, %13 : vector<16x128xf32>
    %c2 = arith.constant 2 : index
    %c0_19 = arith.constant 0 : index
    %15 = vector.load %arg4[%c2, %c0_19] : memref<18x56xf32, #tpu.memory_space<vmem>>, vector<16x56xf32>
    %c112 = arith.constant 112 : index
    %c0_20 = arith.constant 0 : index
    %16 = vector.load %arg2[%c112, %c0_20] : memref<1824x128xf32, #tpu.memory_space<vmem>>, vector<56x128xf32>
    %cst_21 = arith.constant dense<0.000000e+00> : vector<16x128xf32>
    %17 = tpu.matmul %15, %16, %cst_21 {dimension_numbers = #tpu.dot_dimension_numbers<[1], [0], [0], [1], [0, 0, 1, 1], [], []>} : vector<16x56xf32>, vector<56x128xf32>, vector<16x128xf32> -> vector<16x128xf32>
    %18 = arith.addf %14, %17 : vector<16x128xf32>
    %c168 = arith.constant 168 : index
    %c0_22 = arith.constant 0 : index
    %19 = vector.load %arg2[%c168, %c0_22] : memref<1824x128xf32, #tpu.memory_space<vmem>>, vector<1x128xf32>
    %20 = vector.broadcast %19 : vector<1x128xf32> to vector<16x128xf32>
    %21 = arith.addf %18, %20 : vector<16x128xf32>
    %cst_23 = arith.constant 0.000000e+00 : f32
    %22 = vector.broadcast %cst_23 : f32 to vector<16x128xf32>
    %23 = arith.maximumf %21, %22 : vector<16x128xf32>
    %c176 = arith.constant 176 : index
    %c0_24 = arith.constant 0 : index
    %24 = vector.load %arg2[%c176, %c0_24] : memref<1824x128xf32, #tpu.memory_space<vmem>>, vector<128x64xf32>
    %cst_25 = arith.constant dense<0.000000e+00> : vector<16x64xf32>
    %25 = tpu.matmul %23, %24, %cst_25 {dimension_numbers = #tpu.dot_dimension_numbers<[1], [0], [0], [1], [0, 0, 1, 1], [], []>} : vector<16x128xf32>, vector<128x64xf32>, vector<16x64xf32> -> vector<16x64xf32>
    %c304 = arith.constant 304 : index
    %c0_26 = arith.constant 0 : index
    %26 = vector.load %arg2[%c304, %c0_26] : memref<1824x128xf32, #tpu.memory_space<vmem>>, vector<128x64xf32>
    %cst_27 = arith.constant dense<0.000000e+00> : vector<16x64xf32>
    %27 = tpu.matmul %23, %26, %cst_27 {dimension_numbers = #tpu.dot_dimension_numbers<[1], [0], [0], [1], [0, 0, 1, 1], [], []>} : vector<16x128xf32>, vector<128x64xf32>, vector<16x64xf32> -> vector<16x64xf32>
    %28 = arith.maximumf %25, %27 : vector<16x64xf32>
    %c0_28 = arith.constant 0 : index
    %c0_29 = arith.constant 0 : index
    %29 = vector.load %arg7[%c0_28, %c0_29] : memref<18x64xf32, #tpu.memory_space<vmem>>, vector<16x64xf32>
    tpu.vector_store %arg7[%c0_28, %c0_29], %28 {strides = array<i32>} : memref<18x64xf32, #tpu.memory_space<vmem>>, vector<16x64xf32>,
    %c0_30 = arith.constant 0 : index
    %c0_31 = arith.constant 0 : index
    %30 = tpu.strided_load %arg7[%c0_30, %c0_31] {strides = array<i32: 2, 1>} : memref<18x64xf32, #tpu.memory_space<vmem>>, vector<8x64xf32>
    %c1_32 = arith.constant 1 : index
    %c0_33 = arith.constant 0 : index
    %31 = tpu.strided_load %arg7[%c1_32, %c0_33] {strides = array<i32: 2, 1>} : memref<18x64xf32, #tpu.memory_space<vmem>>, vector<8x64xf32>
    %32 = arith.maximumf %30, %31 : vector<8x64xf32>
    %c1_34 = arith.constant 1 : index
    %c0_35 = arith.constant 0 : index
    %33 = vector.load %arg5[%c1_34, %c0_35] : memref<10x72xf32, #tpu.memory_space<vmem>>, vector<8x64xf32>
    tpu.vector_store %arg5[%c1_34, %c0_35], %32 {strides = array<i32>} : memref<10x72xf32, #tpu.memory_space<vmem>>, vector<8x64xf32>,
    %c0_36 = arith.constant 0 : index
    %c0_37 = arith.constant 0 : index
    %34 = vector.load %arg5[%c0_36, %c0_37] : memref<10x72xf32, #tpu.memory_space<vmem>>, vector<8x72xf32>
    %c432 = arith.constant 432 : index
    %c0_38 = arith.constant 0 : index
    %35 = vector.load %arg2[%c432, %c0_38] : memref<1824x128xf32, #tpu.memory_space<vmem>>, vector<72x128xf32>
    %cst_39 = arith.constant dense<0.000000e+00> : vector<8x128xf32>
    %36 = tpu.matmul %34, %35, %cst_39 {dimension_numbers = #tpu.dot_dimension_numbers<[1], [0], [0], [1], [0, 0, 1, 1], [], []>} : vector<8x72xf32>, vector<72x128xf32>, vector<8x128xf32> -> vector<8x128xf32>
    %c1_40 = arith.constant 1 : index
    %c0_41 = arith.constant 0 : index
    %37 = vector.load %arg5[%c1_40, %c0_41] : memref<10x72xf32, #tpu.memory_space<vmem>>, vector<8x72xf32>
    %c504 = arith.constant 504 : index
    %c0_42 = arith.constant 0 : index
    %38 = vector.load %arg2[%c504, %c0_42] : memref<1824x128xf32, #tpu.memory_space<vmem>>, vector<72x128xf32>
    %cst_43 = arith.constant dense<0.000000e+00> : vector<8x128xf32>
    %39 = tpu.matmul %37, %38, %cst_43 {dimension_numbers = #tpu.dot_dimension_numbers<[1], [0], [0], [1], [0, 0, 1, 1], [], []>} : vector<8x72xf32>, vector<72x128xf32>, vector<8x128xf32> -> vector<8x128xf32>
    %40 = arith.addf %36, %39 : vector<8x128xf32>
    %c2_44 = arith.constant 2 : index
    %c0_45 = arith.constant 0 : index
    %41 = vector.load %arg5[%c2_44, %c0_45] : memref<10x72xf32, #tpu.memory_space<vmem>>, vector<8x72xf32>
    %c576 = arith.constant 576 : index
    %c0_46 = arith.constant 0 : index
    %42 = vector.load %arg2[%c576, %c0_46] : memref<1824x128xf32, #tpu.memory_space<vmem>>, vector<72x128xf32>
    %cst_47 = arith.constant dense<0.000000e+00> : vector<8x128xf32>
    %43 = tpu.matmul %41, %42, %cst_47 {dimension_numbers = #tpu.dot_dimension_numbers<[1], [0], [0], [1], [0, 0, 1, 1], [], []>} : vector<8x72xf32>, vector<72x128xf32>, vector<8x128xf32> -> vector<8x128xf32>
    %44 = arith.addf %40, %43 : vector<8x128xf32>
    %c648 = arith.constant 648 : index
    %c0_48 = arith.constant 0 : index
    %45 = vector.load %arg2[%c648, %c0_48] : memref<1824x128xf32, #tpu.memory_space<vmem>>, vector<1x128xf32>
    %46 = vector.broadcast %45 : vector<1x128xf32> to vector<8x128xf32>
    %47 = arith.addf %44, %46 : vector<8x128xf32>
    %cst_49 = arith.constant 0.000000e+00 : f32
    %48 = vector.broadcast %cst_49 : f32 to vector<8x128xf32>
    %49 = arith.maximumf %47, %48 : vector<8x128xf32>
    %c656 = arith.constant 656 : index
    %c0_50 = arith.constant 0 : index
    %50 = vector.load %arg2[%c656, %c0_50] : memref<1824x128xf32, #tpu.memory_space<vmem>>, vector<128x64xf32>
    %cst_51 = arith.constant dense<0.000000e+00> : vector<8x64xf32>
    %51 = tpu.matmul %49, %50, %cst_51 {dimension_numbers = #tpu.dot_dimension_numbers<[1], [0], [0], [1], [0, 0, 1, 1], [], []>} : vector<8x128xf32>, vector<128x64xf32>, vector<8x64xf32> -> vector<8x64xf32>
    %c784 = arith.constant 784 : index
    %c0_52 = arith.constant 0 : index
    %52 = vector.load %arg2[%c784, %c0_52] : memref<1824x128xf32, #tpu.memory_space<vmem>>, vector<128x64xf32>
    %cst_53 = arith.constant dense<0.000000e+00> : vector<8x64xf32>
    %53 = tpu.matmul %49, %52, %cst_53 {dimension_numbers = #tpu.dot_dimension_numbers<[1], [0], [0], [1], [0, 0, 1, 1], [], []>} : vector<8x128xf32>, vector<128x64xf32>, vector<8x64xf32> -> vector<8x64xf32>
    %54 = arith.maximumf %51, %53 : vector<8x64xf32>
    %c0_54 = arith.constant 0 : index
    %c0_55 = arith.constant 0 : index
    %55 = vector.load %arg7[%c0_54, %c0_55] : memref<18x64xf32, #tpu.memory_space<vmem>>, vector<8x64xf32>
    tpu.vector_store %arg7[%c0_54, %c0_55], %54 {strides = array<i32>} : memref<18x64xf32, #tpu.memory_space<vmem>>, vector<8x64xf32>,
    %c0_56 = arith.constant 0 : index
    %c0_57 = arith.constant 0 : index
    %56 = tpu.strided_load %arg7[%c0_56, %c0_57] {strides = array<i32: 2, 1>} : memref<18x64xf32, #tpu.memory_space<vmem>>, vector<4x64xf32>
    %c1_58 = arith.constant 1 : index
    %c0_59 = arith.constant 0 : index
    %57 = tpu.strided_load %arg7[%c1_58, %c0_59] {strides = array<i32: 2, 1>} : memref<18x64xf32, #tpu.memory_space<vmem>>, vector<4x64xf32>
    %58 = arith.maximumf %56, %57 : vector<4x64xf32>
    %c1_60 = arith.constant 1 : index
    %c0_61 = arith.constant 0 : index
    %59 = vector.load %arg6[%c1_60, %c0_61] : memref<6x80xf32, #tpu.memory_space<vmem>>, vector<4x64xf32>
    tpu.vector_store %arg6[%c1_60, %c0_61], %58 {strides = array<i32>} : memref<6x80xf32, #tpu.memory_space<vmem>>, vector<4x64xf32>,
    %c0_62 = arith.constant 0 : index
    %c0_63 = arith.constant 0 : index
    %60 = vector.load %arg6[%c0_62, %c0_63] : memref<6x80xf32, #tpu.memory_space<vmem>>, vector<4x80xf32>
    %c912 = arith.constant 912 : index
    %c0_64 = arith.constant 0 : index
    %61 = vector.load %arg2[%c912, %c0_64] : memref<1824x128xf32, #tpu.memory_space<vmem>>, vector<80x128xf32>
    %cst_65 = arith.constant dense<0.000000e+00> : vector<4x128xf32>
    %62 = tpu.matmul %60, %61, %cst_65 {dimension_numbers = #tpu.dot_dimension_numbers<[1], [0], [0], [1], [0, 0, 1, 1], [], []>} : vector<4x80xf32>, vector<80x128xf32>, vector<4x128xf32> -> vector<4x128xf32>
    %c1_66 = arith.constant 1 : index
    %c0_67 = arith.constant 0 : index
    %63 = vector.load %arg6[%c1_66, %c0_67] : memref<6x80xf32, #tpu.memory_space<vmem>>, vector<4x80xf32>
    %c992 = arith.constant 992 : index
    %c0_68 = arith.constant 0 : index
    %64 = vector.load %arg2[%c992, %c0_68] : memref<1824x128xf32, #tpu.memory_space<vmem>>, vector<80x128xf32>
    %cst_69 = arith.constant dense<0.000000e+00> : vector<4x128xf32>
    %65 = tpu.matmul %63, %64, %cst_69 {dimension_numbers = #tpu.dot_dimension_numbers<[1], [0], [0], [1], [0, 0, 1, 1], [], []>} : vector<4x80xf32>, vector<80x128xf32>, vector<4x128xf32> -> vector<4x128xf32>
    %66 = arith.addf %62, %65 : vector<4x128xf32>
    %c2_70 = arith.constant 2 : index
    %c0_71 = arith.constant 0 : index
    %67 = vector.load %arg6[%c2_70, %c0_71] : memref<6x80xf32, #tpu.memory_space<vmem>>, vector<4x80xf32>
    %c1072 = arith.constant 1072 : index
    %c0_72 = arith.constant 0 : index
    %68 = vector.load %arg2[%c1072, %c0_72] : memref<1824x128xf32, #tpu.memory_space<vmem>>, vector<80x128xf32>
    %cst_73 = arith.constant dense<0.000000e+00> : vector<4x128xf32>
    %69 = tpu.matmul %67, %68, %cst_73 {dimension_numbers = #tpu.dot_dimension_numbers<[1], [0], [0], [1], [0, 0, 1, 1], [], []>} : vector<4x80xf32>, vector<80x128xf32>, vector<4x128xf32> -> vector<4x128xf32>
    %70 = arith.addf %66, %69 : vector<4x128xf32>
    %c1152 = arith.constant 1152 : index
    %c0_74 = arith.constant 0 : index
    %71 = vector.load %arg2[%c1152, %c0_74] : memref<1824x128xf32, #tpu.memory_space<vmem>>, vector<1x128xf32>
    %72 = vector.broadcast %71 : vector<1x128xf32> to vector<4x128xf32>
    %73 = arith.addf %70, %72 : vector<4x128xf32>
    %cst_75 = arith.constant 0.000000e+00 : f32
    %74 = vector.broadcast %cst_75 : f32 to vector<4x128xf32>
    %75 = arith.maximumf %73, %74 : vector<4x128xf32>
    %c1160 = arith.constant 1160 : index
    %c0_76 = arith.constant 0 : index
    %76 = vector.load %arg2[%c1160, %c0_76] : memref<1824x128xf32, #tpu.memory_space<vmem>>, vector<128x64xf32>
    %cst_77 = arith.constant dense<0.000000e+00> : vector<4x64xf32>
    %77 = tpu.matmul %75, %76, %cst_77 {dimension_numbers = #tpu.dot_dimension_numbers<[1], [0], [0], [1], [0, 0, 1, 1], [], []>} : vector<4x128xf32>, vector<128x64xf32>, vector<4x64xf32> -> vector<4x64xf32>
    %c1288 = arith.constant 1288 : index
    %c0_78 = arith.constant 0 : index
    %78 = vector.load %arg2[%c1288, %c0_78] : memref<1824x128xf32, #tpu.memory_space<vmem>>, vector<128x64xf32>
    %cst_79 = arith.constant dense<0.000000e+00> : vector<4x64xf32>
    %79 = tpu.matmul %75, %78, %cst_79 {dimension_numbers = #tpu.dot_dimension_numbers<[1], [0], [0], [1], [0, 0, 1, 1], [], []>} : vector<4x128xf32>, vector<128x64xf32>, vector<4x64xf32> -> vector<4x64xf32>
    %80 = arith.maximumf %77, %79 : vector<4x64xf32>
    %c0_80 = arith.constant 0 : index
    %c0_81 = arith.constant 0 : index
    %81 = vector.load %arg7[%c0_80, %c0_81] : memref<18x64xf32, #tpu.memory_space<vmem>>, vector<4x64xf32>
    tpu.vector_store %arg7[%c0_80, %c0_81], %80 {strides = array<i32>} : memref<18x64xf32, #tpu.memory_space<vmem>>, vector<4x64xf32>,
    %c0_82 = arith.constant 0 : index
    %c0_83 = arith.constant 0 : index
    %82 = tpu.strided_load %arg7[%c0_82, %c0_83] {strides = array<i32: 2, 1>} : memref<18x64xf32, #tpu.memory_space<vmem>>, vector<2x64xf32>
    %c1_84 = arith.constant 1 : index
    %c0_85 = arith.constant 0 : index
    %83 = tpu.strided_load %arg7[%c1_84, %c0_85] {strides = array<i32: 2, 1>} : memref<18x64xf32, #tpu.memory_space<vmem>>, vector<2x64xf32>
    %84 = arith.maximumf %82, %83 : vector<2x64xf32>
    %c0_86 = arith.constant 0 : index
    %c0_87 = arith.constant 0 : index
    %85 = vector.load %arg7[%c0_86, %c0_87] : memref<18x64xf32, #tpu.memory_space<vmem>>, vector<2x64xf32>
    tpu.vector_store %arg7[%c0_86, %c0_87], %84 {strides = array<i32>} : memref<18x64xf32, #tpu.memory_space<vmem>>, vector<2x64xf32>,
    %c0_88 = arith.constant 0 : index
    %c0_89 = arith.constant 0 : index
    %86 = tpu.strided_load %arg7[%c0_88, %c0_89] {strides = array<i32: 3, 1>} : memref<18x64xf32, #tpu.memory_space<vmem>>, vector<1x64xf32>
    %c1_90 = arith.constant 1 : index
    %c0_91 = arith.constant 0 : index
    %87 = tpu.strided_load %arg7[%c1_90, %c0_91] {strides = array<i32: 3, 1>} : memref<18x64xf32, #tpu.memory_space<vmem>>, vector<1x64xf32>
    %c1416 = arith.constant 1416 : index
    %c0_92 = arith.constant 0 : index
    %88 = vector.load %arg2[%c1416, %c0_92] : memref<1824x128xf32, #tpu.memory_space<vmem>>, vector<64x128xf32>
    %cst_93 = arith.constant dense<0.000000e+00> : vector<1x128xf32>
    %89 = tpu.matmul %86, %88, %cst_93 {dimension_numbers = #tpu.dot_dimension_numbers<[1], [0], [0], [1], [0, 0, 1, 1], [], []>} : vector<1x64xf32>, vector<64x128xf32>, vector<1x128xf32> -> vector<1x128xf32>
    %c1480 = arith.constant 1480 : index
    %c0_94 = arith.constant 0 : index
    %90 = vector.load %arg2[%c1480, %c0_94] : memref<1824x128xf32, #tpu.memory_space<vmem>>, vector<64x128xf32>
    %cst_95 = arith.constant dense<0.000000e+00> : vector<1x128xf32>
    %91 = tpu.matmul %87, %90, %cst_95 {dimension_numbers = #tpu.dot_dimension_numbers<[1], [0], [0], [1], [0, 0, 1, 1], [], []>} : vector<1x64xf32>, vector<64x128xf32>, vector<1x128xf32> -> vector<1x128xf32>
    %92 = arith.addf %89, %91 : vector<1x128xf32>
    %c1544 = arith.constant 1544 : index
    %c0_96 = arith.constant 0 : index
    %93 = vector.load %arg2[%c1544, %c0_96] : memref<1824x128xf32, #tpu.memory_space<vmem>>, vector<1x128xf32>
    %94 = arith.addf %92, %93 : vector<1x128xf32>
    %cst_97 = arith.constant 0.000000e+00 : f32
    %95 = vector.broadcast %cst_97 : f32 to vector<1x128xf32>
    %96 = arith.maximumf %94, %95 : vector<1x128xf32>
    %c1552 = arith.constant 1552 : index
    %c0_98 = arith.constant 0 : index
    %97 = vector.load %arg2[%c1552, %c0_98] : memref<1824x128xf32, #tpu.memory_space<vmem>>, vector<128x128xf32>
    %cst_99 = arith.constant dense<0.000000e+00> : vector<1x128xf32>
    %98 = tpu.matmul %96, %97, %cst_99 {dimension_numbers = #tpu.dot_dimension_numbers<[1], [0], [0], [1], [0, 0, 1, 1], [], []>} : vector<1x128xf32>, vector<128x128xf32>, vector<1x128xf32> -> vector<1x128xf32>
    %c1680 = arith.constant 1680 : index
    %c0_100 = arith.constant 0 : index
    %99 = vector.load %arg2[%c1680, %c0_100] : memref<1824x128xf32, #tpu.memory_space<vmem>>, vector<1x128xf32>
    %100 = arith.addf %98, %99 : vector<1x128xf32>
    %cst_101 = arith.constant 0.000000e+00 : f32
    %101 = vector.broadcast %cst_101 : f32 to vector<1x128xf32>
    %102 = arith.maximumf %100, %101 : vector<1x128xf32>
    %c1688 = arith.constant 1688 : index
    %c0_102 = arith.constant 0 : index
    %103 = vector.load %arg2[%c1688, %c0_102] : memref<1824x128xf32, #tpu.memory_space<vmem>>, vector<128x128xf32>
    %cst_103 = arith.constant dense<0.000000e+00> : vector<1x128xf32>
    %104 = tpu.matmul %102, %103, %cst_103 {dimension_numbers = #tpu.dot_dimension_numbers<[1], [0], [0], [1], [0, 0, 1, 1], [], []>} : vector<1x128xf32>, vector<128x128xf32>, vector<1x128xf32> -> vector<1x128xf32>
    %c1816 = arith.constant 1816 : index
    %c0_104 = arith.constant 0 : index
    %105 = vector.load %arg2[%c1816, %c0_104] : memref<1824x128xf32, #tpu.memory_space<vmem>>, vector<1x128xf32>
    %106 = arith.addf %104, %105 : vector<1x128xf32>
    %c0_105 = arith.constant 0 : index
    %c0_106 = arith.constant 0 : index
    %107 = vector.load %arg3[%c0_105, %c0_106] : memref<8x128xf32, #tpu.memory_space<vmem>>, vector<1x128xf32>
    tpu.vector_store %arg3[%c0_105, %c0_106], %106 {strides = array<i32>} : memref<8x128xf32, #tpu.memory_space<vmem>>, vector<1x128xf32>,
    %cst_107 = arith.constant 0.000000e+00 : f32
    %108 = vector.broadcast %cst_107 : f32 to vector<7x128xf32>
    %c1_108 = arith.constant 1 : index
    %c0_109 = arith.constant 0 : index
    %109 = vector.load %arg3[%c1_108, %c0_109] : memref<8x128xf32, #tpu.memory_space<vmem>>, vector<7x128xf32>
    tpu.vector_store %arg3[%c1_108, %c0_109], %108 {strides = array<i32>} : memref<8x128xf32, #tpu.memory_space<vmem>>, vector<7x128xf32>,
    return
  }
  func.func @transform_0(%arg0: i32) -> (i32, i32) {
    %c0_i32 = arith.constant 0 : i32
    %c0_i32_0 = arith.constant 0 : i32
    return %arg0, %c0_i32 : i32, i32
  }
  func.func @transform_1(%arg0: i32) -> (i32, i32) {
    %c0_i32 = arith.constant 0 : i32
    %c0_i32_0 = arith.constant 0 : i32
    %c0_i32_1 = arith.constant 0 : i32
    return %c0_i32, %c0_i32_0 : i32, i32
  }
  func.func @transform_2(%arg0: i32) -> (i32, i32) {
    %c0_i32 = arith.constant 0 : i32
    %c0_i32_0 = arith.constant 0 : i32
    return %arg0, %c0_i32 : i32, i32
  }
}

</mosaic_0001>

<bundles_post_ra>
// kernel: fwd.1
= control target key start
LH: loop header
LB: loop body
LE: loop exit
PB: predicated region body
PF: predicated region fallthrough
CT: control target
= control target key end

     0   :  { %7 = vsyncpa [#allocation7], 0  ;;  %s3147_s9 = smov 0   ;;  %s3348_s0 = inlined_call_operand.vmem [shape: f32[32,48], index: 0, kind: input, shape index: {}]   ;;  %s3349_s1 = inlined_call_operand.hbm [shape: f32[1824,128], index: 1, kind: input, shape index: {}]   ;;  %s3350_s2 = inlined_call_operand.vmem [shape: f32[16,128], index: 2, kind: output, shape index: {}]  }
   0x1 LB: > { %s3153_s10 = sadd.s32 4294967295, %s3124_s9   ;;  %p1935_p0 = scmp.ge.s32.totalorder %s3124_s9, 1  ;;  %s3124_s9 = sphi %s3147_s9, %s13_s9  }
   0x2   : > { %p91_p1 = scmp.lt.s32.totalorder %s3124_s9, 3  ;;  %s3126_s11 = smov [#allocation6]  }
   0x3   : > { %s103_s12 = sshll.u32 %s3126_s11, 4  ;;  %p3351_p3 = scmp.eq.s32.totalorder %s3153_s10, 0  ;;  %s104_s12 = int_to_ptr.vmem [resolvable:$true] %s103_s12 }
   0x4   : > { %p3157_p2 = pnand %p1935_p0, %p91_p1  ;;  %s3086_s17 = scalar_lea.hbm %s3349_s1, 29184 }
   0x5   : > { %p3087_p6 = scmp.ne.s32.totalorder %s3349_s1, %s3086_s17  ;;  %p3093_p10 = scmp.lt.u32.totalorder %s3086_s17, %s3349_s1 }
   0x6   : > { %s3353_s13 = scalar_select %p3157_p2, 1, 0 }
   0x7   : > { %p3066_p4 = pneg %p3157_p2 }
   0x9   : > { %p3166_p5 = pnand %p3351_p3, %p3066_p4 }
   0xb   : > { %p3088_p7 = pneg %p3166_p5 }
   0xd   : > { %p3089_p8 = pnand %p3088_p7, %p3087_p6 }
   0xf   : > { %p3090_p9 = pneg %p3089_p8 }
  0x11   : > { %p3095_p11 = pnand %p3093_p10, %p3090_p9 }
  0x13   : > { %3098 = shalt.err (!%p3095_p11)
}
  0x14   : > { %s3099_s22 = scalar_lea.vmem %s104_s12, 29184  ;;  %p3107_p1 = scmp.lt.s32.totalorder %s104_s12, %s104_s12 }
  0x15   : > { %p3100_p12 = scmp.ne.s32.totalorder %s104_s12, %s3099_s22  ;;  %p3108_p4 = scmp.lt.s32.totalorder %s3099_s22, %s3099_s22 }
  0x17   : > { %p3102_p13 = pnand %p3100_p12, %p3088_p7  ;;  %p3109_p3 = por %p3108_p4, %p3107_p1 }
  0x19   : > { %p3103_p0 = pneg %p3102_p13 }
  0x1b   : > { %p3110_p2 = pnand %p3109_p3, %p3103_p0 }
  0x1d   : > { %3113 = shalt.err (!%p3110_p2)
}
  0x1e   : > { %s3127_s23 = smov 128   ;;  %s3128_s24 = smov 8  }
  0x1f   : > { %3069 = dma.hbm_to_vmem [thread:$0]  (!%p3166_p5), %s3349_s1, 29184, %s104_s12, [#allocation7], %s3127_s23, %s3127_s23, %s3128_s24  }
  0x20   : > { %p3355_p6 = scmp.ne.s32.totalorder %s3353_s13, 0 }
  0x21   : > { %p3356_p8 = scmp.eq.s32.totalorder (!%p3355_p6), %s3153_s10, 0 }
  0x22   : > { %128 = sbr.rel (%p3355_p6) target bundleno = 2148 (0x864), region = 28 }
  0x29   : > { %3119 = dma.done.wait (%p3356_p8), [#allocation7], 29184   ;;  %p3357_p7 = pmov %p3356_p8 }
  0x2a   : > { %s1940_s27 = sshll.u32 %s3153_s10, 1  ;;  %vm159_vm0 = vcmask 457728   ;;  %v3129_v0 = vmov 0.0   ;;  %vm162_vm1 = vcmask 451584   ;;  %v177_v1 = vld [vmem:[#allocation6] sm:$0xff]  ;;  %v178_v2 = vld [vmem:[#allocation6 + $0x8] sm:$0xff] }
  0x2b   : > { %3121 = vsyncadd (%p3357_p7), [#allocation7], 4294938112  ;;  %p150_p2 = scmp.lt.s32.totalorder %s1940_s27, 3  ;;  %160 = vst.msk [vmem:[#allocation2] sm:$0xff] %vm159_vm0, %v3129_v0  ;;  %v179_v3 = vld [vmem:[#allocation6 + $0x10] sm:$0xff]  ;;  %v2721_v4 = vpack.c.bf16 %v178_v2, %v177_v1  ;;  %v180_v5 = vld [vmem:[#allocation6 + $0x18] sm:$0xff] }
  0x2c   : > { %161 = vst.msk [vmem:[#allocation2 + $0x8] sm:$0xff] %vm159_vm0, %v3129_v0  ;;  %v181_v6 = vld [vmem:[#allocation6 + $0x20] sm:$0xff]  ;;  %vm172_vm2 = vcmask 392192   ;;  %v2725_v7 = vpack.c.bf16 %v180_v5, %v179_v3  ;;  %v182_v8 = vld [vmem:[#allocation6 + $0x28] sm:$0xff]  ;;  %v186_v9 = vld [vmem:[#allocation6 + $0x38] sm:$0xff]  ;;  %vm164_vm3 = vcmask 588800  }
  0x2d   : > { %163 = vst.msk [vmem:[#allocation2 + $0x10] sm:$0x3] %vm162_vm1, %v3129_v0  ;;  %s3359_s27 = smov (!%p150_p2, %s1940_s27), 3  ;;  %v187_v10 = vld [vmem:[#allocation6 + $0x40] sm:$0xff]  ;;  %2722 = vmatprep.subr.bf16.mxu0 %v2721_v4  ;;  %v188_v14 = vld [vmem:[#allocation6 + $0x48] sm:$0xff]  ;;  %v189_v15 = vld [vmem:[#allocation6 + $0x50] sm:$0xff]  ;;  %v2729_v16 = vpack.c.bf16 %v182_v8, %v181_v6 }
  0x2e   : > { %s1941_s28 = sshll.u32 %s3359_s27, 3  ;;  %v2709_v11 = vpack.c.bf16 %v187_v10, %v186_v9  ;;  %2724 = vmatpush3.bf16.msra.mxu0 %v2721_v4  ;;  %v2713_v17 = vpack.c.bf16 %v189_v15, %v188_v14  ;;  %v190_v18 = vld [vmem:[#allocation6 + $0x58] sm:$0xff]  ;;  %v191_v19 = vld [vmem:[#allocation6 + $0x60] sm:$0xff]  ;;  %v183_v21 = vld [vmem:[#allocation6 + $0x30] sm:$0xff]  ;;  %vm166_vm4 = vcmask 582656   ;;  %165 = vst.msk [vmem:[#allocation3] sm:$0xff] %vm164_vm3, %v3129_v0 }
  0x2f   : > { %s153_s3 = scalar_lea.vmem %s3348_s0, %s1941_s28  ;;  %2726 = vmatprep.subr.bf16.mxu0 %v2725_v7  ;;  %v2717_v20 = vpack.c.bf16 %v191_v19, %v190_v18  ;;  %v357_v22 = vld [vmem:[#allocation6 + $0x70] sm:$0xff]  ;;  %v358_v23 = vld [vmem:[#allocation6 + $0x78] sm:$0xff]  ;;  %v359_v26 = vld [vmem:[#allocation6 + $0x80] sm:$0xff]  ;;  %167 = vst.msk [vmem:[#allocation3 + $0x8] sm:$0x3] %vm166_vm4, %v3129_v0  ;;  %vm3131_vm5 = vmmov 0  }
  0x30   : > { %v170_v12 = vld [vmem:[%s153_s3] sm:$0xff]  ;;  %v171_v13 = vld [vmem:[%s153_s3 + $0x8] sm:$0xff]  ;;  %2710 = vmatprep.subr.bf16.mxu1 %v2709_v11  ;;  %v360_v27 = vld [vmem:[#allocation6 + $0x88] sm:$0xff]  ;;  %v2733_v29 = vpack.c.bf16 %v358_v23, %v357_v22  ;;  %vm640_vm6 = vcmask 523264   ;;  %vm168_vm7 = vcmask 652288   ;;  %vm1082_vm8 = vcmask 519168  }
  0x31   : > { %173 = vst.msk [vmem:[#allocation2 + $0x1] sm:$0xff] %vm172_vm2, %v170_v12  ;;  %174 = vst.msk [vmem:[#allocation2 + $0x9] sm:$0xff] %vm172_vm2, %v171_v13  ;;  %2712 = vmatpush3.bf16.msra.mxu1 %v2709_v11  ;;  %v192_v28 = vld [vmem:[#allocation6 + $0x68] sm:$0xff]  ;;  %v456_v30 = vld [vmem:[#allocation6 + $0xb0] sm:$0xff]  ;;  %v2737_v33 = vpack.c.bf16 %v360_v27, %v359_v26  ;;  %vm1106_vm9 = vcmask 654336   ;;  %vm1522_vm10 = vcmask 517120  }
  0x32   : > { %2714 = vmatprep.subr.bf16.mxu1 %v2713_v17  ;;  %2728 = vmatpush3.bf16.msra.mxu0 %v2725_v7  ;;  %v457_v31 = vld [vmem:[#allocation6 + $0xb8] sm:$0xff]  ;;  %v458_v34 = vld [vmem:[#allocation6 + $0xc0] sm:$0xff]  ;;  %v459_v35 = vld [vmem:[#allocation6 + $0xc8] sm:$0xff]  ;;  %169 = vst.msk [vmem:[#allocation4] sm:$0x3f] %vm168_vm7, %v3129_v0  ;;  %p155_p3 = scmp.lt.s32.totalorder %s3153_s10, 1 }
  0x33   : > { %2730 = vmatprep.subr.bf16.mxu0 %v2729_v16  ;;  %v361_v36 = vld [vmem:[#allocation6 + $0x90] sm:$0xff]  ;;  %v362_v37 = vld [vmem:[#allocation6 + $0x98] sm:$0xff]  ;;  %v2745_v39 = vpack.c.bf16 %v457_v31, %v456_v30  ;;  %v2749_v41 = vpack.c.bf16 %v459_v35, %v458_v34  ;;  %v462_v46 = vld [vmem:[#allocation6 + $0xe0] sm:$0xff] }
  0x34   : > { %v2741_v42 = vpack.c.bf16 %v362_v37, %v361_v36  ;;  %v460_v43 = vld [vmem:[#allocation6 + $0xd0] sm:$0xff]  ;;  %v461_v44 = vld [vmem:[#allocation6 + $0xd8] sm:$0xff]  ;;  %v463_v47 = vld [vmem:[#allocation6 + $0xe8] sm:$0xff]  ;;  %s3361_s10 = smov (!%p155_p3, %s3153_s10), 1 }
  0x35   : > { %2716 = vmatpush3.bf16.msra.mxu1 %v2713_v17  ;;  %v2753_v45 = vpack.c.bf16 %v461_v44, %v460_v43  ;;  %v363_v48 = vld [vmem:[#allocation6 + $0xa0] sm:$0xff]  ;;  %v2757_v49 = vpack.c.bf16 %v463_v47, %v462_v46  ;;  %v464_v50 = vld [vmem:[#allocation6 + $0xf0] sm:$0xff]  ;;  %v465_v51 = vld [vmem:[#allocation6 + $0xf8] sm:$0xff]  ;;  %s1942_s4 = sshll.u32 %s3361_s10, 3 }
  0x36   : > { %2718 = vmatprep.subr.bf16.mxu1 %v2717_v20  ;;  %2732 = vmatpush3.bf16.msra.mxu0 %v2729_v16  ;;  %v2761_v53 = vpack.c.bf16 %v465_v51, %v464_v50  ;;  %v466_v54 = vld [vmem:[#allocation6 + $0x100] sm:$0xff]  ;;  %v467_v55 = vld [vmem:[#allocation6 + $0x108] sm:$0xff]  ;;  %v468_v57 = vld [vmem:[#allocation6 + $0x110] sm:$0xff]  ;;  %s158_s7 = scalar_lea.vmem %s3350_s2, %s1942_s4 }
  0x37   : > { %2237 = vmatprep.subr.mxu0 %v183_v21  ;;  %v2765_v56 = vpack.c.bf16 %v467_v55, %v466_v54  ;;  %v469_v58 = vld [vmem:[#allocation6 + $0x118] sm:$0xff]  ;;  %v470_v60 = vld [vmem:[#allocation6 + $0x120] sm:$0xff]  ;;  %v471_v61 = vld [vmem:[#allocation6 + $0x128] sm:$0xff]  ;;  %1867 = vst [vmem:[%s158_s7 + $0x1] sm:$0x7f] %v3129_v0 }
  0x38   : > { %v175_v24 = vld [vmem:[#allocation2] sm:$0xff]  ;;  %v176_v32 = vld [vmem:[#allocation2 + $0x8] sm:$0xff]  ;;  %v2769_v59 = vpack.c.bf16 %v469_v58, %v468_v57  ;;  %v2773_v62 = vpack.c.bf16 %v471_v61, %v470_v60  ;;  %v547_v63 = vld [vmem:[#allocation6 + $0x130] sm:$0xff] }
  0x39   : > { %v184_v25 = vld [vmem:[#allocation2 + $0x1] sm:$0xff]  ;;  %2239 = vmatprep.mubr.msk.f32.mxu0 %vm159_vm0, %v175_v24  ;;  %2720 = vmatpush3.bf16.msra.mxu1 %v2717_v20  ;;  %v185_v40 = vld [vmem:[#allocation2 + $0x9] sm:$0xff]  ;;  %v551_v17 = vld [vmem:[#allocation6 + $0x150] sm:$0xff] }
  0x3a   : > { %2222 = vmatprep.mubr.msk.f32.mxu1 %vm159_vm0, %v184_v25  ;;  %2220 = vmatprep.subr.mxu1 %v192_v28  ;;  %v355_v38 = vld [vmem:[#allocation2 + $0x2] sm:$0xff]  ;;  %v356_v52 = vld [vmem:[#allocation2 + $0xa] sm:$0xff]  ;;  %v555_v23 = vld [vmem:[#allocation6 + $0x170] sm:$0xff] }
  0x3b   : > { %2238 = vmatpush3.msra.mxu0 %v183_v21  ;;  %v548_v1 = vld [vmem:[#allocation6 + $0x138] sm:$0xff]  ;;  %v1949_v6 = vld [vmem:[#allocation6 + $0xa8] ss:$0 sm:$0xff]  ;;  %v549_v12 = vld [vmem:[#allocation6 + $0x140] sm:$0xff] }
  0x3c   : > { %2734 = vmatprep.subr.bf16.mxu0 %v2733_v29  ;;  %2240 = vmatmul.mubr.msk.f32.vlgmr.msra.gmra.mrb[0].mxu0 %vm159_vm0, %v176_v32  ;;  %v2777_v2 = vpack.c.bf16 %v548_v1, %v547_v63  ;;  %v550_v13 = vld [vmem:[#allocation6 + $0x148] sm:$0xff]  ;;  %v552_v18 = vld [vmem:[#allocation6 + $0x158] sm:$0xff]  ;;  %v553_v20 = vld [vmem:[#allocation6 + $0x160] sm:$0xff] }
  0x3d   : > { %2736 = vmatpush3.bf16.msra.mxu0 %v2733_v29  ;;  %2221 = vmatpush3.msra.mxu1 %v192_v28  ;;  %v2781_v16 = vpack.c.bf16 %v550_v13, %v549_v12  ;;  %v2785_v19 = vpack.c.bf16 %v552_v18, %v551_v17  ;;  %v554_v21 = vld [vmem:[#allocation6 + $0x168] sm:$0xff]  ;;  %v556_v24 = vld [vmem:[#allocation6 + $0x178] sm:$0xff]  ;;  %v557_v26 = vld [vmem:[#allocation6 + $0x180] sm:$0xff] }
  0x3e   : > { %2738 = vmatprep.subr.bf16.mxu0 %v2737_v33  ;;  %2256 = vmatprep.mubr.msk.f32.mxu0 %vm159_vm0, %v355_v38  ;;  %v2789_v22 = vpack.c.bf16 %v554_v21, %v553_v20  ;;  %v2793_v25 = vpack.c.bf16 %v556_v24, %v555_v23  ;;  %v558_v27 = vld [vmem:[#allocation6 + $0x188] sm:$0xff]  ;;  %v559_v29 = vld [vmem:[#allocation6 + $0x190] sm:$0xff]  ;;  %v560_v30 = vld [vmem:[#allocation6 + $0x198] sm:$0xff] }
  0x3f   : > { %2223 = vmatmul.mubr.msk.f32.vlgmr.msra.gmra.mrb[0].mxu1 %vm159_vm0, %v185_v40  ;;  %2746 = vmatprep.subr.bf16.mxu1 %v2745_v39  ;;  %v2797_v28 = vpack.c.bf16 %v558_v27, %v557_v26  ;;  %v2801_v31 = vpack.c.bf16 %v560_v30, %v559_v29  ;;  %v561_v32 = vld [vmem:[#allocation6 + $0x1a0] sm:$0xff]  ;;  %v659_v35 = vld [vmem:[#allocation6 + $0x1f8] sm:$0xff]  ;;  %v3130_v40 = vmov 0.0|0.0   ;;  %v662_v43 = vld [vmem:[#allocation6 + $0x210] sm:$0xff] }
  0x40   : > { %2748 = vmatpush3.bf16.msra.mxu1 %v2745_v39  ;;  %v660_v36 = vld [vmem:[#allocation6 + $0x200] sm:$0xff]  ;;  %v816_v39 = vld [vmem:[#allocation6 + $0x248] sm:$0xff]  ;;  %v817_v44 = vld [vmem:[#allocation6 + $0x250] sm:$0xff] }
  0x41   : > { %2740 = vmatpush3.bf16.msra.mxu0 %v2737_v33  ;;  %2750 = vmatprep.subr.bf16.mxu1 %v2749_v41  ;;  %v562_v33 = vld [vmem:[#allocation6 + $0x1a8] sm:$0xff]  ;;  %v2810_v37 = vpack.c.bf16 %v660_v36, %v659_v35  ;;  %v815_v38 = vld [vmem:[#allocation6 + $0x240] sm:$0xff]  ;;  %v818_v46 = vld [vmem:[#allocation6 + $0x258] sm:$0xff] }
  0x42   : > { %2742 = vmatprep.subr.bf16.mxu0 %v2741_v42  ;;  %v2805_v34 = vpack.c.bf16 %v562_v33, %v561_v32  ;;  %v663_v47 = vld [vmem:[#allocation6 + $0x218] sm:$0xff]  ;;  %v819_v50 = vld [vmem:[#allocation6 + $0x260] sm:$0xff]  ;;  %v820_v51 = vld [vmem:[#allocation6 + $0x268] sm:$0xff] }
  0x43   : > { %v665_v54 = vld [vmem:[#allocation6 + $0x228] sm:$0xff]  ;;  %v666_v55 = vld [vmem:[#allocation6 + $0x230] sm:$0xff]  ;;  %v822_v57 = vld [vmem:[#allocation6 + $0x278] sm:$0xff] }
  0x44   : > { %2752 = vmatpush3.bf16.msra.mxu1 %v2749_v41  ;;  %v2834_v41 = vpack.c.bf16 %v816_v39, %v815_v38  ;;  %v2819_v58 = vpack.c.bf16 %v666_v55, %v665_v54  ;;  %v667_v60 = vld [vmem:[#allocation6 + $0x238] sm:$0xff]  ;;  %v823_v61 = vld [vmem:[#allocation6 + $0x280] sm:$0xff]  ;;  %v653_v21 = vld [vmem:[#allocation6 + $0x1d0] sm:$0xff] }
  0x45   : > { %2744 = vmatpush3.bf16.msra.mxu0 %v2741_v42  ;;  %2754 = vmatprep.subr.bf16.mxu1 %v2753_v45  ;;  %v661_v42 = vld [vmem:[#allocation6 + $0x208] sm:$0xff]  ;;  %v651_v13 = vld [vmem:[#allocation6 + $0x1c0] sm:$0xff]  ;;  %v906_v29 = vld [vmem:[#allocation6 + $0x298] sm:$0xff] }
  0x46   : > { %2254 = vmatprep.subr.mxu0 %v363_v48  ;;  %v656_v26 = vld [vmem:[#allocation6 + $0x1e8] sm:$0xff]  ;;  %v657_v30 = vld [vmem:[#allocation6 + $0x1f0] sm:$0xff]  ;;  %v907_v32 = vld [vmem:[#allocation6 + $0x2a0] sm:$0xff] }
  0x47   : > { %v908_v33 = vld [vmem:[#allocation6 + $0x2a8] sm:$0xff]  ;;  %v909_v36 = vld [vmem:[#allocation6 + $0x2b0] sm:$0xff]  ;;  %v915_v55 = vld [vmem:[#allocation6 + $0x2e0] sm:$0xff] }
  0x48   : > { %2756 = vmatpush3.bf16.msra.mxu1 %v2753_v45  ;;  %v2813_v45 = vpack.c.bf16 %v662_v43, %v661_v42  ;;  %v2849_v35 = vpack.c.bf16 %v908_v33, %v907_v32  ;;  %v995_v38 = vld [vmem:[#allocation6 + $0x330] sm:$0xff]  ;;  %v911_v42 = vld [vmem:[#allocation6 + $0x2c0] sm:$0xff]  ;;  %v912_v43 = vld [vmem:[#allocation6 + $0x2c8] sm:$0xff] }
  0x49   : > { %2255 = vmatpush3.msra.mxu0 %v363_v48  ;;  %2758 = vmatprep.subr.bf16.mxu1 %v2757_v49  ;;  %v664_v48 = vld [vmem:[#allocation6 + $0x220] sm:$0xff] }
  0x4a   : > { %2257 = vmatmul.mubr.msk.f32.vlgmr.msra.gmra.mrb[0].mxu0 %vm159_vm0, %v356_v52  ;;  %2809 = vmatprep.subr.bf16.mxu0 %v3130_v40  ;;  %v2816_v52 = vpack.c.bf16 %v664_v48, %v663_v47  ;;  %v2855_v47 = vpack.c.bf16 %v912_v43, %v911_v42  ;;  %v1100_v32 = vld [vmem:[#allocation6 + $0x400] sm:$0xff]  ;;  %v1092_v43 = vld [vmem:[#allocation6 + $0x3c8] sm:$0xff] }
  0x4b   : > { %2811 = vmatpush3.bf16.msra.mxu0 %v2810_v37  ;;  %2347 = vmatprep.mubr.msk.f32.mxu0 %vm3131_vm5, %v3129_v0  ;;  %v910_v37 = vld [vmem:[#allocation6 + $0x2b8] sm:$0xff]  ;;  %v1091_v42 = vld [vmem:[#allocation6 + $0x3c0] sm:$0xff] }
  0x4c   : > { %2760 = vmatpush3.bf16.msra.mxu1 %v2757_v49  ;;  %2812 = vmatprep.subr.bf16.mxu0 %v3130_v40  ;;  %v2837_v49 = vpack.c.bf16 %v818_v46, %v817_v44  ;;  %v2852_v39 = vpack.c.bf16 %v910_v37, %v909_v36  ;;  %v998_v46 = vld [vmem:[#allocation6 + $0x348] sm:$0xff]  ;;  %v1090_v36 = vld [vmem:[#allocation6 + $0x3b8] sm:$0xff] }
  0x4d   : > { %2762 = vmatprep.subr.bf16.mxu1 %v2761_v53 }
  0x4f   : > { %2814 = vmatpush3.bf16.msra.mxu0 %v2813_v45  ;;  %v997_v45 = vld [vmem:[#allocation6 + $0x340] sm:$0xff] }
  0x50   : > { %2764 = vmatpush3.bf16.msra.mxu1 %v2761_v53  ;;  %2815 = vmatprep.subr.bf16.mxu0 %v3130_v40  ;;  %v2840_v53 = vpack.c.bf16 %v820_v51, %v819_v50  ;;  %v2879_v48 = vpack.c.bf16 %v998_v46, %v997_v45  ;;  %v914_v50 = vld [vmem:[#allocation6 + $0x2d8] sm:$0xff]  ;;  %v999_v51 = vld [vmem:[#allocation6 + $0x350] sm:$0xff]  ;;  %v2918_v45 = vpack.c.bf16 %v1092_v43, %v1091_v42  ;;  %v1104_v46 = vld [vmem:[#allocation6 + $0x420] sm:$0xff] }
  0x51   : > { %2766 = vmatprep.subr.bf16.mxu1 %v2765_v56  ;;  %v1439_v42 = vld [vmem:[#allocation6 + $0x548] sm:$0xff]  ;;  %v1440_v43 = vld [vmem:[#allocation6 + $0x550] sm:$0xff] }
  0x53   : > { %2817 = vmatpush3.bf16.msra.mxu0 %v2816_v52  ;;  %v1000_v52 = vld [vmem:[#allocation6 + $0x358] sm:$0xff] }
  0x54   : > { %2768 = vmatpush3.bf16.msra.mxu1 %v2765_v56  ;;  %v821_v56 = vld [vmem:[#allocation6 + $0x270] sm:$0xff]  ;;  %2818 = vmatprep.subr.bf16.mxu0 %v3130_v40  ;;  %v2882_v54 = vpack.c.bf16 %v1000_v52, %v999_v51 }
  0x55   : > { %2770 = vmatprep.subr.bf16.mxu1 %v2769_v59 }
  0x57   : > { %2820 = vmatpush3.bf16.msra.mxu0 %v2819_v58  ;;  %v1002_v58 = vld [vmem:[#allocation6 + $0x368] sm:$0xff] }
  0x58   : > { %2772 = vmatpush3.bf16.msra.mxu1 %v2769_v59  ;;  %v2843_v59 = vpack.c.bf16 %v822_v57, %v821_v56  ;;  %2345 = vmatprep.subr.mxu0 %v3129_v0  ;;  %v916_v56 = vld [vmem:[#allocation6 + $0x2e8] sm:$0xff]  ;;  %v1001_v57 = vld [vmem:[#allocation6 + $0x360] sm:$0xff] }
  0x59   : > { %2774 = vmatprep.subr.bf16.mxu1 %v2773_v62 }
  0x5b   : > { %2346 = vmatpush3.msra.mxu0 %v667_v60  ;;  %v2885_v60 = vpack.c.bf16 %v1002_v58, %v1001_v57 }
  0x5c   : > { %2776 = vmatpush3.bf16.msra.mxu1 %v2773_v62  ;;  %2821 = vmatprep.subr.bf16.mxu0 %v3130_v40 }
  0x5d   : > { %2778 = vmatprep.subr.bf16.mxu1 %v2777_v2 }
 0x112   : > { %v2224_v3 = vpop.f32.mrb[0].mxu1 }
 0x113   : > { %v265_v4 = vpop.f32.mrb[1].mxu1 }
 0x11d   : > { %v2258_v5 = vpop.f32.mrb[0].mxu0 }
 0x11e   : > { %v3058_v7 = vadd.f32 %v2258_v5, %v2224_v3  ;;  %v436_v8 = vpop.f32.mrb[1].mxu0 }
 0x11f   : > { %v3059_v9 = vadd.f32 %v436_v8, %v265_v4  ;;  %v649_v8 = vld [vmem:[#allocation6 + $0x1b0] sm:$0xff] }
 0x120   : > { %v453_v10 = vadd.f32 %v3058_v7, %v1949_v6 }
 0x121   : > { %v452_v11 = vadd.f32 %v3059_v9, %v1949_v6  ;;  %v650_v9 = vld [vmem:[#allocation6 + $0x1b8] sm:$0xff] }
 0x122   : > { %v455_v15 = vmax.f32 %v453_v10, 0.0  ;;  %v991_v10 = vld [vmem:[#allocation6 + $0x310] sm:$0xff]  ;;  %v2822_v12 = vpack.c.bf16 %v650_v9, %v649_v8  ;;  %v1006_v8 = vld [vmem:[#allocation6 + $0x388] sm:$0xff] }
 0x123   : > { %v454_v14 = vmax.f32 %v452_v11, 0.0  ;;  %v992_v11 = vld [vmem:[#allocation6 + $0x318] sm:$0xff] }
 0x125   : > { %2291 = vmatprep.mubr.f32.mxu1 %v454_v14 }
 0x126   : > { %2292 = vmatmul.mubr.f32.vlgmr.msra.gmra.mrb[2].mxu1 %v455_v15 }
 0x127   : > { %2780 = vmatpush3.bf16.msra.mxu1 %v2777_v2  ;;  %2326 = vmatprep.mubr.f32.mxu1 %v454_v14  ;;  %v652_v14 = vld [vmem:[#allocation6 + $0x1c8] sm:$0xff] }
 0x128   : > { %2782 = vmatprep.subr.bf16.mxu1 %v2781_v16  ;;  %v2825_v20 = vpack.c.bf16 %v652_v14, %v651_v13 }
 0x12b   : > { %2784 = vmatpush3.bf16.msra.mxu1 %v2781_v16  ;;  %v993_v16 = vld [vmem:[#allocation6 + $0x320] sm:$0xff] }
 0x12c   : > { %2786 = vmatprep.subr.bf16.mxu1 %v2785_v19 }
 0x12f   : > { %2788 = vmatpush3.bf16.msra.mxu1 %v2785_v19  ;;  %v994_v19 = vld [vmem:[#allocation6 + $0x328] sm:$0xff] }
 0x130   : > { %2790 = vmatprep.subr.bf16.mxu1 %v2789_v22  ;;  %v2873_v23 = vpack.c.bf16 %v994_v19, %v993_v16 }
 0x133   : > { %2792 = vmatpush3.bf16.msra.mxu1 %v2789_v22  ;;  %v654_v22 = vld [vmem:[#allocation6 + $0x1d8] sm:$0xff] }
 0x134   : > { %2794 = vmatprep.subr.bf16.mxu1 %v2793_v25  ;;  %v2828_v24 = vpack.c.bf16 %v654_v22, %v653_v21  ;;  %v1096_v21 = vld [vmem:[#allocation6 + $0x3e0] sm:$0xff]  ;;  %v1097_v22 = vld [vmem:[#allocation6 + $0x3e8] sm:$0xff] }
 0x137   : > { %2796 = vmatpush3.bf16.msra.mxu1 %v2793_v25  ;;  %v655_v25 = vld [vmem:[#allocation6 + $0x1e0] sm:$0xff] }
 0x138   : > { %2798 = vmatprep.subr.bf16.mxu1 %v2797_v28  ;;  %v2831_v27 = vpack.c.bf16 %v656_v26, %v655_v25  ;;  %v1086_v25 = vld [vmem:[#allocation6 + $0x398] sm:$0xff] }
 0x13b   : > { %2800 = vmatpush3.bf16.msra.mxu1 %v2797_v28  ;;  %v905_v28 = vld [vmem:[#allocation6 + $0x290] sm:$0xff] }
 0x13c   : > { %2802 = vmatprep.subr.bf16.mxu1 %v2801_v31 }
 0x13f   : > { %2804 = vmatpush3.bf16.msra.mxu1 %v2801_v31  ;;  %v2846_v31 = vpack.c.bf16 %v906_v29, %v905_v28  ;;  %v1099_v28 = vld [vmem:[#allocation6 + $0x3f8] sm:$0xff] }
 0x140   : > { %2806 = vmatprep.subr.bf16.mxu1 %v2805_v34 }
 0x143   : > { %2808 = vmatpush3.bf16.msra.mxu1 %v2805_v34 }
 0x144   : > { %2833 = vmatprep.subr.bf16.mxu1 %v3130_v40 }
 0x146   : > { %2327 = vmatmul.mubr.f32.vlgmr.msra.gmra.mrb[4].mxu1 %v455_v15  ;;  %v2870_v15 = vpack.c.bf16 %v992_v11, %v991_v10 }
 0x147   : > { %2835 = vmatpush3.bf16.msra.mxu1 %v2834_v41  ;;  %2389 = vmatprep.mubr.msk.f32.mxu1 %vm3131_vm5, %v3129_v0  ;;  %v996_v41 = vld [vmem:[#allocation6 + $0x338] sm:$0xff] }
 0x148   : > { %2836 = vmatprep.subr.bf16.mxu1 %v3130_v40  ;;  %v2876_v44 = vpack.c.bf16 %v996_v41, %v995_v38  ;;  %v1103_v41 = vld [vmem:[#allocation6 + $0x418] sm:$0xff] }
 0x14b   : > { %2838 = vmatpush3.bf16.msra.mxu1 %v2837_v49  ;;  %v913_v49 = vld [vmem:[#allocation6 + $0x2d0] sm:$0xff] }
 0x14c   : > { %2839 = vmatprep.subr.bf16.mxu1 %v3130_v40 }
 0x14f   : > { %2841 = vmatpush3.bf16.msra.mxu1 %v2840_v53  ;;  %v2858_v53 = vpack.c.bf16 %v914_v50, %v913_v49  ;;  %v1094_v49 = vld [vmem:[#allocation6 + $0x3d8] sm:$0xff] }
 0x150   : > { %2842 = vmatprep.subr.bf16.mxu1 %v3130_v40 }
 0x153   : > { %2844 = vmatpush3.bf16.msra.mxu1 %v2843_v59  ;;  %v2861_v59 = vpack.c.bf16 %v916_v56, %v915_v55 }
 0x154   : > { %2387 = vmatprep.subr.mxu1 %v3129_v0 }
 0x157   : > { %2388 = vmatpush3.msra.mxu1 %v823_v61  ;;  %v917_v61 = vld [vmem:[#allocation6 + $0x2f0] sm:$0xff] }
 0x158   : > { %2869 = vmatprep.subr.bf16.mxu1 %v3130_v40 }
 0x1f9   : > { %v2293_v62 = vpop.f32.mrb[2].mxu1 }
 0x1fa   : > { %v538_v63 = vpop.f32.mrb[3].mxu1 }
 0x219   : > { %v2328_v1 = vpop.f32.mrb[4].mxu1 }
 0x21a   : > { %v639_v2 = vmax.f32 %v2293_v62, %v2328_v1  ;;  %v629_v3 = vpop.f32.mrb[5].mxu1  ;;  %v918_v62 = vld [vmem:[#allocation6 + $0x2f8] sm:$0xff] }
 0x21b   : > { %v638_v4 = vmax.f32 %v538_v63, %v629_v3  ;;  %v1003_v63 = vld [vmem:[#allocation6 + $0x370] sm:$0xff]  ;;  %v2864_v1 = vpack.c.bf16 %v918_v62, %v917_v61  ;;  %v1255_v61 = vld [vmem:[#allocation6 + $0x438] sm:$0xff]  ;;  %v1345_v62 = vld [vmem:[#allocation6 + $0x488] sm:$0xff] }
 0x21c   : > { %642 = vst.msk [vmem:[#allocation5 + $0x8] sm:$0xff] %vm640_vm6, %v639_v2  ;;  %v1004_v2 = vld [vmem:[#allocation6 + $0x378] sm:$0xff] }
 0x21d   : > { %641 = vst.msk [vmem:[#allocation5] sm:$0xff] %vm640_vm6, %v638_v4  ;;  %v2888_v3 = vpack.c.bf16 %v1004_v2, %v1003_v63  ;;  %v919_v4 = vld [vmem:[#allocation6 + $0x300] sm:$0xff]  ;;  %v1346_v63 = vld [vmem:[#allocation6 + $0x490] sm:$0xff] }
 0x21e   : > { %v1256_v2 = vld [vmem:[#allocation6 + $0x440] sm:$0xff] }
 0x224   : > { %v643_v5 = vld [vmem:[#allocation5] ss:$2 sm:$0xff]  ;;  %v645_v6 = vld [vmem:[#allocation5 + $0x1] ss:$2 sm:$0xff] }
 0x225   : > { %v646_v7 = vmax.f32 %v643_v5, %v645_v6  ;;  %v920_v5 = vld [vmem:[#allocation6 + $0x308] sm:$0xff] }
 0x226   : > { %v2867_v6 = vpack.c.bf16 %v920_v5, %v919_v4  ;;  %v2939_v4 = vpack.c.bf16 %v1346_v63, %v1345_v62  ;;  %v1347_v5 = vld [vmem:[#allocation6 + $0x498] sm:$0xff]  ;;  %v1446_v62 = vld [vmem:[#allocation6 + $0x580] sm:$0xff] }
 0x227   : > { %647 = vst.msk [vmem:[#allocation3 + $0x1] sm:$0xff] %vm640_vm6, %v646_v7  ;;  %v1005_v7 = vld [vmem:[#allocation6 + $0x380] sm:$0xff] }
 0x228   : > { %v2891_v9 = vpack.c.bf16 %v1006_v8, %v1005_v7  ;;  %v1348_v8 = vld [vmem:[#allocation6 + $0x4a0] sm:$0xff] }
 0x22e   : > { %v658_v17 = vld [vmem:[#allocation3 + $0x1] sm:$0xff] }
 0x22f   : > { %v814_v18 = vld [vmem:[#allocation3 + $0x2] sm:$0xff]  ;;  %2348 = vmatmul.mubr.msk.f32.vlgmr.msra.gmra.mrb[2].mxu0 %vm164_vm3, %v658_v17  ;;  %v1953_v17 = vld [vmem:[#allocation6 + $0x288] ss:$0 sm:$0xff] }
 0x230   : > { %2390 = vmatmul.mubr.msk.f32.vlgmr.msra.gmra.mrb[6].mxu1 %vm164_vm3, %v814_v18  ;;  %2823 = vmatpush3.bf16.msra.mxu0 %v2822_v12  ;;  %v648_v34 = vld [vmem:[#allocation3] sm:$0xff] }
 0x231   : > { %2368 = vmatprep.mubr.msk.f32.mxu0 %vm3131_vm5, %v3129_v0  ;;  %2824 = vmatprep.subr.bf16.mxu0 %v3130_v40 }
 0x232   : > { %2871 = vmatpush3.bf16.msra.mxu1 %v2870_v15  ;;  %2459 = vmatprep.mubr.msk.f32.mxu1 %vm3131_vm5, %v3129_v0 }
 0x233   : > { %2872 = vmatprep.subr.bf16.mxu1 %v3130_v40 }
 0x234   : > { %2826 = vmatpush3.bf16.msra.mxu0 %v2825_v20 }
 0x235   : > { %2827 = vmatprep.subr.bf16.mxu0 %v3130_v40 }
 0x236   : > { %2874 = vmatpush3.bf16.msra.mxu1 %v2873_v23  ;;  %v2894_v23 = vpack.c.bf16 %v1097_v22, %v1096_v21  ;;  %v1432_v21 = vld [vmem:[#allocation6 + $0x510] sm:$0xff] }
 0x237   : > { %2875 = vmatprep.subr.bf16.mxu1 %v3130_v40 }
 0x238   : > { %2829 = vmatpush3.bf16.msra.mxu0 %v2828_v24  ;;  %v1085_v24 = vld [vmem:[#allocation6 + $0x390] sm:$0xff] }
 0x239   : > { %2830 = vmatprep.subr.bf16.mxu0 %v3130_v40  ;;  %v2909_v26 = vpack.c.bf16 %v1086_v25, %v1085_v24  ;;  %v1434_v24 = vld [vmem:[#allocation6 + $0x520] sm:$0xff] }
 0x23a   : > { %2877 = vmatpush3.bf16.msra.mxu1 %v2876_v44 }
 0x23b   : > { %2878 = vmatprep.subr.bf16.mxu1 %v3130_v40 }
 0x23c   : > { %2832 = vmatpush3.bf16.msra.mxu0 %v2831_v27  ;;  %v1098_v27 = vld [vmem:[#allocation6 + $0x3f0] sm:$0xff] }
 0x23d   : > { %2366 = vmatprep.subr.mxu0 %v3129_v0  ;;  %v2897_v29 = vpack.c.bf16 %v1099_v28, %v1098_v27  ;;  %v1349_v27 = vld [vmem:[#allocation6 + $0x4a8] sm:$0xff]  ;;  %v1350_v28 = vld [vmem:[#allocation6 + $0x4b0] sm:$0xff] }
 0x23e   : > { %2880 = vmatpush3.bf16.msra.mxu1 %v2879_v48  ;;  %v1093_v48 = vld [vmem:[#allocation6 + $0x3d0] sm:$0xff] }
 0x23f   : > { %2881 = vmatprep.subr.bf16.mxu1 %v3130_v40  ;;  %v2921_v51 = vpack.c.bf16 %v1094_v49, %v1093_v48  ;;  %v1441_v48 = vld [vmem:[#allocation6 + $0x558] sm:$0xff]  ;;  %v1442_v49 = vld [vmem:[#allocation6 + $0x560] sm:$0xff] }
 0x240   : > { %2367 = vmatpush3.msra.mxu0 %v657_v30  ;;  %v1087_v30 = vld [vmem:[#allocation6 + $0x3a0] sm:$0xff] }
 0x241   : > { %2369 = vmatmul.mubr.msk.f32.vlgmr.msra.gmra.mrb[4].mxu0 %vm164_vm3, %v648_v34  ;;  %2845 = vmatprep.subr.bf16.mxu0 %v3130_v40  ;;  %v1101_v34 = vld [vmem:[#allocation6 + $0x408] sm:$0xff] }
 0x242   : > { %2847 = vmatpush3.bf16.msra.mxu0 %v2846_v31  ;;  %2424 = vmatprep.mubr.msk.f32.mxu0 %vm3131_vm5, %v3129_v0  ;;  %v1088_v31 = vld [vmem:[#allocation6 + $0x3a8] sm:$0xff]  ;;  %v2900_v37 = vpack.c.bf16 %v1101_v34, %v1100_v32  ;;  %v1351_v32 = vld [vmem:[#allocation6 + $0x4b8] sm:$0xff] }
 0x243   : > { %2848 = vmatprep.subr.bf16.mxu0 %v3130_v40  ;;  %2883 = vmatpush3.bf16.msra.mxu1 %v2882_v54  ;;  %v2912_v33 = vpack.c.bf16 %v1088_v31, %v1087_v30  ;;  %v2945_v30 = vpack.c.bf16 %v1350_v28, %v1349_v27  ;;  %v1436_v31 = vld [vmem:[#allocation6 + $0x530] sm:$0xff] }
 0x244   : > { %2884 = vmatprep.subr.bf16.mxu1 %v3130_v40  ;;  %v1531_v27 = vld [vmem:[#allocation6 + $0x5b0] sm:$0xff] }
 0x246   : > { %2850 = vmatpush3.bf16.msra.mxu0 %v2849_v35  ;;  %v1089_v35 = vld [vmem:[#allocation6 + $0x3b0] sm:$0xff] }
 0x247   : > { %2851 = vmatprep.subr.bf16.mxu0 %v3130_v40  ;;  %2886 = vmatpush3.bf16.msra.mxu1 %v2885_v60  ;;  %v2915_v38 = vpack.c.bf16 %v1090_v36, %v1089_v35  ;;  %v1254_v60 = vld [vmem:[#allocation6 + $0x430] sm:$0xff]  ;;  %v1437_v35 = vld [vmem:[#allocation6 + $0x538] sm:$0xff]  ;;  %v1438_v36 = vld [vmem:[#allocation6 + $0x540] sm:$0xff] }
 0x248   : > { %2887 = vmatprep.subr.bf16.mxu1 %v3130_v40 }
 0x24a   : > { %2853 = vmatpush3.bf16.msra.mxu0 %v2852_v39  ;;  %v1102_v39 = vld [vmem:[#allocation6 + $0x410] sm:$0xff] }
 0x24b   : > { %2854 = vmatprep.subr.bf16.mxu0 %v3130_v40  ;;  %2889 = vmatpush3.bf16.msra.mxu1 %v2888_v3  ;;  %v2903_v44 = vpack.c.bf16 %v1103_v41, %v1102_v39  ;;  %v1257_v3 = vld [vmem:[#allocation6 + $0x448] sm:$0xff]  ;;  %v1354_v41 = vld [vmem:[#allocation6 + $0x4d0] sm:$0xff] }
 0x24c   : > { %2890 = vmatprep.subr.bf16.mxu1 %v3130_v40  ;;  %v1353_v39 = vld [vmem:[#allocation6 + $0x4c8] sm:$0xff] }
 0x24e   : > { %2856 = vmatpush3.bf16.msra.mxu0 %v2855_v47  ;;  %v1105_v47 = vld [vmem:[#allocation6 + $0x428] sm:$0xff] }
 0x24f   : > { %2857 = vmatprep.subr.bf16.mxu0 %v3130_v40  ;;  %2892 = vmatpush3.bf16.msra.mxu1 %v2891_v9  ;;  %v2906_v50 = vpack.c.bf16 %v1105_v47, %v1104_v46  ;;  %v2927_v9 = vpack.c.bf16 %v1257_v3, %v1256_v2  ;;  %v1355_v46 = vld [vmem:[#allocation6 + $0x4d8] sm:$0xff]  ;;  %v1356_v47 = vld [vmem:[#allocation6 + $0x4e0] sm:$0xff] }
 0x250   : > { %2908 = vmatprep.subr.bf16.mxu1 %v3130_v40 }
 0x252   : > { %2859 = vmatpush3.bf16.msra.mxu0 %v2858_v53 }
 0x253   : > { %2860 = vmatprep.subr.bf16.mxu0 %v3130_v40 }
 0x256   : > { %2862 = vmatpush3.bf16.msra.mxu0 %v2861_v59 }
 0x257   : > { %2863 = vmatprep.subr.bf16.mxu0 %v3130_v40 }
 0x25a   : > { %2865 = vmatpush3.bf16.msra.mxu0 %v2864_v1  ;;  %v2924_v1 = vpack.c.bf16 %v1255_v61, %v1254_v60  ;;  %v1445_v61 = vld [vmem:[#allocation6 + $0x578] sm:$0xff] }
 0x25b   : > { %2866 = vmatprep.subr.bf16.mxu0 %v3130_v40  ;;  %v2984_v63 = vpack.c.bf16 %v1446_v62, %v1445_v61  ;;  %v1701_v62 = vld [vmem:[#allocation6 + $0x660] sm:$0xff] }
 0x25e   : > { %2868 = vmatpush3.bf16.msra.mxu0 %v2867_v6 }
 0x25f   : > { %2893 = vmatprep.subr.bf16.mxu0 %v3130_v40 }
 0x302   : > { %v737_v10 = vpop.f32.mrb[2].mxu0 }
 0x303   : > { %v893_v11 = vpop.f32.mrb[6].mxu1  ;;  %v2349_v12 = vpop.f32.mrb[3].mxu0 }
 0x304   : > { %v2391_v13 = vpop.f32.mrb[7].mxu1  ;;  %v2942_v12 = vpack.c.bf16 %v1348_v8, %v1347_v5 }
 0x314   : > { %v810_v14 = vpop.f32.mrb[4].mxu0 }
 0x315   : > { %v811_v15 = vadd.f32 %v810_v14, %v737_v10  ;;  %v2370_v16 = vpop.f32.mrb[5].mxu0  ;;  %v1258_v10 = vld [vmem:[#allocation6 + $0x450] sm:$0xff]  ;;  %v1260_v14 = vld [vmem:[#allocation6 + $0x460] sm:$0xff] }
 0x317   : > { %v897_v18 = vadd.f32 %v893_v11, %v811_v15  ;;  %v1259_v11 = vld [vmem:[#allocation6 + $0x458] sm:$0xff]  ;;  %v1261_v15 = vld [vmem:[#allocation6 + $0x468] sm:$0xff] }
 0x318   : > { %v2930_v13 = vpack.c.bf16 %v1259_v11, %v1258_v10  ;;  %v2933_v16 = vpack.c.bf16 %v1261_v15, %v1260_v14  ;;  %v1526_v14 = vld [vmem:[#allocation6 + $0x588] sm:$0xff] }
 0x319   : > { %v903_v19 = vadd.f32 %v1953_v17, %v897_v18  ;;  %v1262_v17 = vld [vmem:[#allocation6 + $0x470] sm:$0xff]  ;;  %v1263_v18 = vld [vmem:[#allocation6 + $0x478] sm:$0xff] }
 0x31b   : > { %v904_v20 = vmax.f32 %v903_v19, 0.0  ;;  %v2936_v19 = vpack.c.bf16 %v1263_v18, %v1262_v17  ;;  %v1536_v17 = vld [vmem:[#allocation6 + $0x5d8] sm:$0xff]  ;;  %v1537_v18 = vld [vmem:[#allocation6 + $0x5e0] sm:$0xff] }
 0x31d   : > { %2425 = vmatmul.mubr.f32.vlgmr.msra.gmra.mrb[6].mxu0 %v904_v20  ;;  %2460 = vmatmul.mubr.f32.vlgmr.msra.gmra.mrb[8].mxu1 %v904_v20  ;;  %v1431_v20 = vld [vmem:[#allocation6 + $0x508] sm:$0xff] }
 0x31e   : > { %2482 = vmatprep.mubr.msk.f32.mxu0 %vm3131_vm5, %v3129_v0  ;;  %2505 = vmatprep.mubr.msk.f32.mxu1 %vm3131_vm5, %v3129_v0  ;;  %v2963_v22 = vpack.c.bf16 %v1432_v21, %v1431_v20  ;;  %v1528_v20 = vld [vmem:[#allocation6 + $0x598] sm:$0xff]  ;;  %v1529_v21 = vld [vmem:[#allocation6 + $0x5a0] sm:$0xff] }
 0x31f   : > { %2895 = vmatpush3.bf16.msra.mxu0 %v2894_v23  ;;  %2910 = vmatpush3.bf16.msra.mxu1 %v2909_v26  ;;  %v1433_v23 = vld [vmem:[#allocation6 + $0x518] sm:$0xff] }
 0x320   : > { %2896 = vmatprep.subr.bf16.mxu0 %v3130_v40  ;;  %2911 = vmatprep.subr.bf16.mxu1 %v3130_v40  ;;  %v2966_v26 = vpack.c.bf16 %v1434_v24, %v1433_v23  ;;  %v3002_v23 = vpack.c.bf16 %v1529_v21, %v1528_v20  ;;  %v1538_v24 = vld [vmem:[#allocation6 + $0x5e8] sm:$0xff]  ;;  %v1787_v20 = vld [vmem:[#allocation6 + $0x6d8] sm:$0xff]  ;;  %v1788_v21 = vld [vmem:[#allocation6 + $0x6e0] sm:$0xff] }
 0x323   : > { %2898 = vmatpush3.bf16.msra.mxu0 %v2897_v29  ;;  %2913 = vmatpush3.bf16.msra.mxu1 %v2912_v33  ;;  %v1435_v29 = vld [vmem:[#allocation6 + $0x528] sm:$0xff]  ;;  %v1352_v33 = vld [vmem:[#allocation6 + $0x4c0] sm:$0xff] }
 0x324   : > { %2899 = vmatprep.subr.bf16.mxu0 %v3130_v40  ;;  %2914 = vmatprep.subr.bf16.mxu1 %v3130_v40  ;;  %v2969_v34 = vpack.c.bf16 %v1436_v31, %v1435_v29  ;;  %v1541_v31 = vld [vmem:[#allocation6 + $0x600] sm:$0xff] }
 0x327   : > { %2901 = vmatpush3.bf16.msra.mxu0 %v2900_v37  ;;  %2916 = vmatpush3.bf16.msra.mxu1 %v2915_v38  ;;  %v2948_v37 = vpack.c.bf16 %v1352_v33, %v1351_v32  ;;  %v2972_v38 = vpack.c.bf16 %v1438_v36, %v1437_v35  ;;  %v1532_v32 = vld [vmem:[#allocation6 + $0x5b8] sm:$0xff]  ;;  %v1533_v33 = vld [vmem:[#allocation6 + $0x5c0] sm:$0xff] }
 0x328   : > { %2902 = vmatprep.subr.bf16.mxu0 %v3130_v40  ;;  %2917 = vmatprep.subr.bf16.mxu1 %v3130_v40  ;;  %v3008_v35 = vpack.c.bf16 %v1533_v33, %v1532_v32 }
 0x32b   : > { %2904 = vmatpush3.bf16.msra.mxu0 %v2903_v44  ;;  %2919 = vmatpush3.bf16.msra.mxu1 %v2918_v45  ;;  %v2951_v44 = vpack.c.bf16 %v1354_v41, %v1353_v39  ;;  %v2975_v45 = vpack.c.bf16 %v1440_v43, %v1439_v42 }
 0x32c   : > { %2905 = vmatprep.subr.bf16.mxu0 %v3130_v40  ;;  %2920 = vmatprep.subr.bf16.mxu1 %v3130_v40 }
 0x32f   : > { %2907 = vmatpush3.bf16.msra.mxu0 %v2906_v50  ;;  %2922 = vmatpush3.bf16.msra.mxu1 %v2921_v51  ;;  %v2954_v50 = vpack.c.bf16 %v1356_v47, %v1355_v46  ;;  %v2978_v51 = vpack.c.bf16 %v1442_v49, %v1441_v48  ;;  %v1692_v46 = vld [vmem:[#allocation6 + $0x618] sm:$0xff]  ;;  %v1693_v48 = vld [vmem:[#allocation6 + $0x620] sm:$0xff]  ;;  %v1694_v49 = vld [vmem:[#allocation6 + $0x628] sm:$0xff] }
 0x330   : > { %2923 = vmatprep.subr.bf16.mxu0 %v3130_v40  ;;  %2938 = vmatprep.subr.bf16.mxu1 %v3130_v40 }
 0x3f0   : > { %v987_v52 = vpop.f32.mrb[6].mxu0  ;;  %v1073_v53 = vpop.f32.mrb[8].mxu1 }
 0x3f1   : > { %v1077_v54 = vmax.f32 %v987_v52, %v1073_v53  ;;  %v2426_v55 = vpop.f32.mrb[7].mxu0  ;;  %v2461_v56 = vpop.f32.mrb[9].mxu1  ;;  %v1357_v52 = vld [vmem:[#allocation6 + $0x4e8] sm:$0xff]  ;;  %v1358_v53 = vld [vmem:[#allocation6 + $0x4f0] sm:$0xff] }
 0x3f2   : > { %v2957_v55 = vpack.c.bf16 %v1358_v53, %v1357_v52  ;;  %v1444_v56 = vld [vmem:[#allocation6 + $0x570] sm:$0xff]  ;;  %v3014_v52 = vpack.c.bf16 %v1694_v49, %v1693_v48 }
 0x3f3   : > { %1078 = vst.msk [vmem:[#allocation5] sm:$0xff] %vm640_vm6, %v1077_v54  ;;  %v1443_v54 = vld [vmem:[#allocation6 + $0x568] sm:$0xff]  ;;  %v1695_v53 = vld [vmem:[#allocation6 + $0x630] sm:$0xff] }
 0x3fa   : > { %v1079_v57 = vld [vmem:[#allocation5] ss:$2 sm:$0xf]  ;;  %v1080_v58 = vld [vmem:[#allocation5 + $0x1] ss:$2 sm:$0xf] }
 0x3fb   : > { %v1081_v59 = vmax.f32 %v1079_v57, %v1080_v58  ;;  %v2981_v57 = vpack.c.bf16 %v1444_v56, %v1443_v54  ;;  %v1359_v58 = vld [vmem:[#allocation6 + $0x4f8] sm:$0xff]  ;;  %v1697_v56 = vld [vmem:[#allocation6 + $0x640] sm:$0xff] }
 0x3fc   : > { %v1696_v54 = vld [vmem:[#allocation6 + $0x638] sm:$0xff] }
 0x3fd   : > { %1083 = vst.msk [vmem:[#allocation4 + $0x1] sm:$0xf] %vm1082_vm8, %v1081_v59  ;;  %v1360_v59 = vld [vmem:[#allocation6 + $0x500] sm:$0xff] }
 0x3fe   : > { %v2960_v60 = vpack.c.bf16 %v1360_v59, %v1359_v58  ;;  %v1699_v59 = vld [vmem:[#allocation6 + $0x650] sm:$0xff] }
 0x404   : > { %v1095_v6 = vld [vmem:[#allocation4 + $0x1] sm:$0xf] }
 0x405   : > { %v1084_v7 = vld [vmem:[#allocation4] sm:$0xf]  ;;  %2483 = vmatmul.mubr.msk.f32.vlgmr.msra.gmra.mrb[8].mxu0 %vm1106_vm9, %v1095_v6 }
 0x406   : > { %2506 = vmatmul.mubr.msk.f32.vlgmr.msra.gmra.mrb[10].mxu1 %vm1106_vm9, %v1084_v7  ;;  %2925 = vmatpush3.bf16.msra.mxu0 %v2924_v1  ;;  %v1253_v25 = vld [vmem:[#allocation4 + $0x2] sm:$0xf]  ;;  %v1957_v7 = vld [vmem:[#allocation6 + $0x480] ss:$0 sm:$0xff] }
 0x407   : > { %2528 = vmatprep.mubr.msk.f32.mxu0 %vm3131_vm5, %v3129_v0  ;;  %2926 = vmatprep.subr.bf16.mxu0 %v3130_v40 }
 0x408   : > { %2940 = vmatpush3.bf16.msra.mxu1 %v2939_v4  ;;  %2563 = vmatprep.mubr.msk.f32.mxu1 %vm3131_vm5, %v3129_v0 }
 0x409   : > { %2941 = vmatprep.subr.bf16.mxu1 %v3130_v40 }
 0x40a   : > { %2928 = vmatpush3.bf16.msra.mxu0 %v2927_v9 }
 0x40b   : > { %2929 = vmatprep.subr.bf16.mxu0 %v3130_v40 }
 0x40c   : > { %2943 = vmatpush3.bf16.msra.mxu1 %v2942_v12  ;;  %v1534_v12 = vld [vmem:[#allocation6 + $0x5c8] sm:$0xff] }
 0x40d   : > { %2944 = vmatprep.subr.bf16.mxu1 %v3130_v40 }
 0x40e   : > { %2931 = vmatpush3.bf16.msra.mxu0 %v2930_v13  ;;  %v1535_v13 = vld [vmem:[#allocation6 + $0x5d0] sm:$0xff] }
 0x40f   : > { %2932 = vmatprep.subr.bf16.mxu0 %v3130_v40  ;;  %v2987_v15 = vpack.c.bf16 %v1535_v13, %v1534_v12  ;;  %v1782_v12 = vld [vmem:[#allocation6 + $0x6b0] sm:$0xff] }
 0x410   : > { %2946 = vmatpush3.bf16.msra.mxu1 %v2945_v30  ;;  %v1540_v30 = vld [vmem:[#allocation6 + $0x5f8] sm:$0xff] }
 0x411   : > { %2947 = vmatprep.subr.bf16.mxu1 %v3130_v40 }
 0x412   : > { %2934 = vmatpush3.bf16.msra.mxu0 %v2933_v16  ;;  %v1527_v16 = vld [vmem:[#allocation6 + $0x590] sm:$0xff] }
 0x413   : > { %2935 = vmatprep.subr.bf16.mxu0 %v3130_v40 }
 0x414   : > { %2949 = vmatpush3.bf16.msra.mxu1 %v2948_v37 }
 0x415   : > { %2950 = vmatprep.subr.bf16.mxu1 %v3130_v40 }
 0x416   : > { %2937 = vmatpush3.bf16.msra.mxu0 %v2936_v19  ;;  %v2999_v19 = vpack.c.bf16 %v1527_v16, %v1526_v14  ;;  %v1783_v14 = vld [vmem:[#allocation6 + $0x6b8] sm:$0xff] }
 0x417   : > { %2962 = vmatprep.subr.bf16.mxu0 %v3130_v40 }
 0x418   : > { %2952 = vmatpush3.bf16.msra.mxu1 %v2951_v44 }
 0x419   : > { %2529 = vmatmul.mubr.msk.f32.vlgmr.msra.gmra.mrb[10].mxu0 %vm1106_vm9, %v1253_v25  ;;  %2953 = vmatprep.subr.bf16.mxu1 %v3130_v40  ;;  %v1539_v25 = vld [vmem:[#allocation6 + $0x5f0] sm:$0xff] }
 0x41a   : > { %2964 = vmatpush3.bf16.msra.mxu0 %v2963_v22  ;;  %2598 = vmatprep.mubr.msk.f32.mxu0 %vm3131_vm5, %v3129_v0  ;;  %v2990_v22 = vpack.c.bf16 %v1537_v18, %v1536_v17  ;;  %v2993_v28 = vpack.c.bf16 %v1539_v25, %v1538_v24  ;;  %v1785_v17 = vld [vmem:[#allocation6 + $0x6c8] sm:$0xff]  ;;  %v1786_v18 = vld [vmem:[#allocation6 + $0x6d0] sm:$0xff] }
 0x41b   : > { %2965 = vmatprep.subr.bf16.mxu0 %v3130_v40  ;;  %v1790_v24 = vld [vmem:[#allocation6 + $0x6f0] sm:$0xff] }
 0x41c   : > { %2955 = vmatpush3.bf16.msra.mxu1 %v2954_v50 }
 0x41d   : > { %2956 = vmatprep.subr.bf16.mxu1 %v3130_v40 }
 0x41e   : > { %2967 = vmatpush3.bf16.msra.mxu0 %v2966_v26  ;;  %v1530_v26 = vld [vmem:[#allocation6 + $0x5a8] sm:$0xff] }
 0x41f   : > { %2968 = vmatprep.subr.bf16.mxu0 %v3130_v40  ;;  %v3005_v29 = vpack.c.bf16 %v1531_v27, %v1530_v26  ;;  %v1791_v26 = vld [vmem:[#allocation6 + $0x6f8] sm:$0xff]  ;;  %v1792_v27 = vld [vmem:[#allocation6 + $0x700] sm:$0xff] }
 0x420   : > { %2958 = vmatpush3.bf16.msra.mxu1 %v2957_v55  ;;  %v3017_v55 = vpack.c.bf16 %v1696_v54, %v1695_v53 }
 0x421   : > { %2959 = vmatprep.subr.bf16.mxu1 %v3130_v40 }
 0x422   : > { %2970 = vmatpush3.bf16.msra.mxu0 %v2969_v34  ;;  %v2996_v34 = vpack.c.bf16 %v1541_v31, %v1540_v30  ;;  %v1688_v31 = vld [vmem:[#allocation6 + $0x608] sm:$0x1] }
 0x423   : > { %2971 = vmatprep.subr.bf16.mxu0 %v3130_v40 }
 0x424   : > { %2961 = vmatpush3.bf16.msra.mxu1 %v2960_v60  ;;  %v1700_v60 = vld [vmem:[#allocation6 + $0x658] sm:$0xff] }
 0x425   : > { %2986 = vmatprep.subr.bf16.mxu1 %v3130_v40  ;;  %v3023_v61 = vpack.c.bf16 %v1700_v60, %v1699_v59 }
 0x426   : > { %2973 = vmatpush3.bf16.msra.mxu0 %v2972_v38 }
 0x427   : > { %2974 = vmatprep.subr.bf16.mxu0 %v3130_v40 }
 0x42a   : > { %2976 = vmatpush3.bf16.msra.mxu0 %v2975_v45  ;;  %v1691_v45 = vld [vmem:[#allocation6 + $0x610] sm:$0xff] }
 0x42b   : > { %2977 = vmatprep.subr.bf16.mxu0 %v3130_v40  ;;  %v3011_v47 = vpack.c.bf16 %v1692_v46, %v1691_v45  ;;  %v1795_v45 = vld [vmem:[#allocation6 + $0x718] sm:$0x1] }
 0x42e   : > { %2979 = vmatpush3.bf16.msra.mxu0 %v2978_v51 }
 0x42f   : > { %2980 = vmatprep.subr.bf16.mxu0 %v3130_v40 }
 0x432   : > { %2982 = vmatpush3.bf16.msra.mxu0 %v2981_v57  ;;  %v1698_v57 = vld [vmem:[#allocation6 + $0x648] sm:$0xff] }
 0x433   : > { %2983 = vmatprep.subr.bf16.mxu0 %v3130_v40  ;;  %v3020_v58 = vpack.c.bf16 %v1698_v57, %v1697_v56 }
 0x436   : > { %2985 = vmatpush3.bf16.msra.mxu0 %v2984_v63  ;;  %v1702_v63 = vld [vmem:[#allocation6 + $0x668] sm:$0xff] }
 0x437   : > { %2998 = vmatprep.subr.bf16.mxu0 %v3130_v40 }
 0x4d8   : > { %v1176_v1 = vpop.f32.mrb[8].mxu0 }
 0x4d9   : > { %v1249_v2 = vpop.f32.mrb[10].mxu1  ;;  %v2484_v4 = vpop.f32.mrb[9].mxu0 }
 0x4da   : > { %v1250_v3 = vadd.f32 %v1249_v2, %v1176_v1  ;;  %v2507_v5 = vpop.f32.mrb[11].mxu1  ;;  %v3026_v1 = vpack.c.bf16 %v1702_v63, %v1701_v62  ;;  %v1703_v2 = vld [vmem:[#allocation6 + $0x670] sm:$0xff] }
 0x4db   : > { %v1705_v5 = vld [vmem:[#allocation6 + $0x680] sm:$0xff] }
 0x4ec   : > { %v1333_v6 = vpop.f32.mrb[10].mxu0 }
 0x4ed   : > { %v1337_v8 = vadd.f32 %v1333_v6, %v1250_v3  ;;  %v2530_v9 = vpop.f32.mrb[11].mxu0  ;;  %v1704_v3 = vld [vmem:[#allocation6 + $0x678] sm:$0xff]  ;;  %v1706_v6 = vld [vmem:[#allocation6 + $0x688] sm:$0xff] }
 0x4ee   : > { %v3029_v4 = vpack.c.bf16 %v1704_v3, %v1703_v2  ;;  %v1780_v9 = vld [vmem:[#allocation6 + $0x6a0] sm:$0xff] }
 0x4ef   : > { %v1343_v10 = vadd.f32 %v1957_v7, %v1337_v8  ;;  %v3032_v7 = vpack.c.bf16 %v1706_v6, %v1705_v5  ;;  %v1779_v8 = vld [vmem:[#allocation6 + $0x698] sm:$0xff] }
 0x4f1   : > { %v1344_v11 = vmax.f32 %v1343_v10, 0.0  ;;  %v1781_v10 = vld [vmem:[#allocation6 + $0x6a8] sm:$0xff] }
 0x4f2   : > { %v3038_v13 = vpack.c.bf16 %v1782_v12, %v1781_v10 }
 0x4f3   : > { %2564 = vmatmul.mubr.f32.vlgmr.msra.gmra.mrb[12].mxu1 %v1344_v11  ;;  %2599 = vmatmul.mubr.f32.vlgmr.msra.gmra.mrb[12].mxu0 %v1344_v11  ;;  %v3035_v11 = vpack.c.bf16 %v1780_v9, %v1779_v8 }
 0x4f4   : > { %2617 = vmatprep.mubr.msk.f32.mxu1 %vm3131_vm5, %v3129_v0  ;;  %2636 = vmatprep.mubr.msk.f32.mxu0 %vm3131_vm5, %v3129_v0 }
 0x4f5   : > { %2988 = vmatpush3.bf16.msra.mxu1 %v2987_v15  ;;  %3000 = vmatpush3.bf16.msra.mxu0 %v2999_v19  ;;  %v1784_v15 = vld [vmem:[#allocation6 + $0x6c0] sm:$0xff]  ;;  %v3044_v19 = vpack.c.bf16 %v1786_v18, %v1785_v17 }
 0x4f6   : > { %2989 = vmatprep.subr.bf16.mxu1 %v3130_v40  ;;  %3001 = vmatprep.subr.bf16.mxu0 %v3130_v40  ;;  %v3041_v16 = vpack.c.bf16 %v1784_v15, %v1783_v14 }
 0x4f9   : > { %2991 = vmatpush3.bf16.msra.mxu1 %v2990_v22  ;;  %3003 = vmatpush3.bf16.msra.mxu0 %v3002_v23  ;;  %v3047_v22 = vpack.c.bf16 %v1788_v21, %v1787_v20  ;;  %v1789_v23 = vld [vmem:[#allocation6 + $0x6e8] sm:$0xff] }
 0x4fa   : > { %2992 = vmatprep.subr.bf16.mxu1 %v3130_v40  ;;  %3004 = vmatprep.subr.bf16.mxu0 %v3130_v40  ;;  %v3050_v25 = vpack.c.bf16 %v1790_v24, %v1789_v23 }
 0x4fd   : > { %2994 = vmatpush3.bf16.msra.mxu1 %v2993_v28  ;;  %3006 = vmatpush3.bf16.msra.mxu0 %v3005_v29  ;;  %v3053_v28 = vpack.c.bf16 %v1792_v27, %v1791_v26 }
 0x4fe   : > { %2995 = vmatprep.subr.bf16.mxu1 %v3130_v40  ;;  %3007 = vmatprep.subr.bf16.mxu0 %v3130_v40 }
 0x501   : > { %2997 = vmatpush3.bf16.msra.mxu1 %v2996_v34  ;;  %3009 = vmatpush3.bf16.msra.mxu0 %v3008_v35 }
 0x502   : > { %3010 = vmatprep.subr.bf16.mxu1 %v3130_v40  ;;  %3034 = vmatprep.subr.bf16.mxu0 %v3130_v40 }
 0x5c6   : > { %v1427_v36 = vpop.f32.mrb[12].mxu1  ;;  %v1513_v37 = vpop.f32.mrb[12].mxu0 }
 0x5c7   : > { %v1517_v38 = vmax.f32 %v1427_v36, %v1513_v37  ;;  %v2565_v39 = vpop.f32.mrb[13].mxu1  ;;  %v2600_v41 = vpop.f32.mrb[13].mxu0  ;;  %v1793_v37 = vld [vmem:[#allocation6 + $0x708] sm:$0xff] }
 0x5c9   : > { %1518 = vst.msk [vmem:[#allocation5] sm:$0xf] %vm1082_vm8, %v1517_v38  ;;  %v1794_v38 = vld [vmem:[#allocation6 + $0x710] sm:$0xff] }
 0x5ca   : > { %v3056_v39 = vpack.c.bf16 %v1794_v38, %v1793_v37 }
 0x5d0   : > { %v1519_v42 = vld [vmem:[#allocation5] ss:$2 sm:$0x3]  ;;  %v1520_v43 = vld [vmem:[#allocation5 + $0x1] ss:$2 sm:$0x3] }
 0x5d1   : > { %v1521_v44 = vmax.f32 %v1519_v42, %v1520_v43 }
 0x5d3   : > { %1523 = vst.msk [vmem:[#allocation5] sm:$0x3] %vm1522_vm10, %v1521_v44 }
 0x5da   : > { %v1525_v50 = vld [vmem:[#allocation5 + $0x1] ss:$3 sm:$0x1]  ;;  %v1524_v51 = vld [vmem:[#allocation5] ss:$3 sm:$0x1] }
 0x5db   : > { %2618 = vmatmul.mubr.msk.f32.vlgmr.msra.gmra.mrb[14].mxu1 %vm640_vm6, %v1525_v50  ;;  %2637 = vmatmul.mubr.msk.f32.vlgmr.msra.gmra.mrb[14].mxu0 %vm640_vm6, %v1524_v51 }
 0x5dc   : > { %3012 = vmatpush3.bf16.msra.mxu1 %v3011_v47  ;;  %2671 = vmatprep.mubr.msk.f32.mxu1 %vm3131_vm5, %v3129_v0 }
 0x5dd   : > { %3013 = vmatprep.subr.bf16.mxu1 %v3130_v40  ;;  %2706 = vmatprep.mubr.msk.f32.mxu0 %vm3131_vm5, %v3129_v0 }
 0x5de   : > { %3036 = vmatpush3.bf16.msra.mxu0 %v3035_v11 }
 0x5df   : > { %3037 = vmatprep.subr.bf16.mxu0 %v3130_v40 }
 0x5e0   : > { %3015 = vmatpush3.bf16.msra.mxu1 %v3014_v52 }
 0x5e1   : > { %3016 = vmatprep.subr.bf16.mxu1 %v3130_v40 }
 0x5e2   : > { %3039 = vmatpush3.bf16.msra.mxu0 %v3038_v13 }
 0x5e3   : > { %3040 = vmatprep.subr.bf16.mxu0 %v3130_v40 }
 0x5e4   : > { %3018 = vmatpush3.bf16.msra.mxu1 %v3017_v55 }
 0x5e5   : > { %3019 = vmatprep.subr.bf16.mxu1 %v3130_v40 }
 0x5e6   : > { %3042 = vmatpush3.bf16.msra.mxu0 %v3041_v16 }
 0x5e7   : > { %3043 = vmatprep.subr.bf16.mxu0 %v3130_v40 }
 0x5e8   : > { %3021 = vmatpush3.bf16.msra.mxu1 %v3020_v58 }
 0x5e9   : > { %3022 = vmatprep.subr.bf16.mxu1 %v3130_v40 }
 0x5ea   : > { %3045 = vmatpush3.bf16.msra.mxu0 %v3044_v19 }
 0x5eb   : > { %3046 = vmatprep.subr.bf16.mxu0 %v3130_v40 }
 0x5ec   : > { %3024 = vmatpush3.bf16.msra.mxu1 %v3023_v61 }
 0x5ed   : > { %3025 = vmatprep.subr.bf16.mxu1 %v3130_v40 }
 0x5ee   : > { %3048 = vmatpush3.bf16.msra.mxu0 %v3047_v22 }
 0x5ef   : > { %3049 = vmatprep.subr.bf16.mxu0 %v3130_v40 }
 0x5f0   : > { %3027 = vmatpush3.bf16.msra.mxu1 %v3026_v1 }
 0x5f1   : > { %3028 = vmatprep.subr.bf16.mxu1 %v3130_v40 }
 0x5f2   : > { %3051 = vmatpush3.bf16.msra.mxu0 %v3050_v25 }
 0x5f3   : > { %3052 = vmatprep.subr.bf16.mxu0 %v3130_v40 }
 0x5f4   : > { %3030 = vmatpush3.bf16.msra.mxu1 %v3029_v4 }
 0x5f5   : > { %3031 = vmatprep.subr.bf16.mxu1 %v3130_v40 }
 0x5f6   : > { %3054 = vmatpush3.bf16.msra.mxu0 %v3053_v28 }
 0x5f7   : > { %3055 = vmatprep.subr.bf16.mxu0 %v3130_v40  ;;  %v1707_v40 = vld [vmem:[#allocation6 + $0x690] sm:$0x1] }
 0x5f8   : > { %3033 = vmatpush3.bf16.msra.mxu1 %v3032_v7 }
 0x5fa   : > { %3057 = vmatpush3.bf16.msra.mxu0 %v3056_v39 }
 0x6ae   : > { %v1611_v29 = vpop.f32.mrb[14].mxu1  ;;  %v1684_v30 = vpop.f32.mrb[14].mxu0 }
 0x6af   : > { %v1685_v32 = vadd.f32 %v1684_v30, %v1611_v29  ;;  %v2619_v33 = vpop.f32.mrb[15].mxu1  ;;  %v2638_v34 = vpop.f32.mrb[15].mxu0 }
 0x6b1   : > { %v1689_v35 = vadd.f32 %v1688_v31, %v1685_v32 }
 0x6b3   : > { %v1690_v36 = vmax.f32 %v1689_v35, 0.0 }
 0x6b5   : > { %2672 = vmatmul.mubr.f32.vlgmr.msra.gmra.mrb[16].mxu1 %v1690_v36 }
 0x788   : > { %v1774_v41 = vpop.f32.mrb[16].mxu1 }
 0x789   : > { %v1775_v42 = vadd.f32 %v1774_v41, %v1707_v40  ;;  %v2673_v43 = vpop.f32.mrb[17].mxu1 }
 0x78b   : > { %v1778_v44 = vmax.f32 %v1775_v42, 0.0 }
 0x78d   : > { %2707 = vmatmul.mubr.f32.vlgmr.msra.gmra.mrb[16].mxu0 %v1778_v44 }
 0x860   : > { %v1862_v46 = vpop.f32.mrb[16].mxu0 }
 0x861   : > { %v1863_v47 = vadd.f32 %v1862_v46, %v1795_v45  ;;  %v2708_v48 = vpop.f32.mrb[17].mxu0 }
 0x863   : > { %1866 = vst [vmem:[%s158_s7] sm:$0x1] %v1863_v47 }
 0x864 PF: > { %s13_s9 = sadd.s32 1, %s3124_s9  }
 0x865   : > { %p10_p5 = scmp.ge.s32.totalorder %s13_s9, 4  }
 0x867   :  { %12 = sbr.rel (!%p10_p5) target bundleno = 1 (0x1), region = 64 }
 0x86e   :  { %1887 = vsyncpa [#allocation7], 1 }
 0x86f   :  { %1889 = vsyncpa [#allocation7 + $0x1], 1 }

</bundles_post_ra>
